<compile_context>
chip_gen: v5e
topology: v5e:2x2
jax: 0.10.0
libtpu: 0.0.40
codegen_flags: <defaults>
</compile_context>

<pallas_src>
import functools

import jax
import jax.numpy as jnp
from jax.experimental import pallas as pl
from jax.experimental.pallas import tpu as pltpu

A_DIM = 6
HID = 128
SEQ = 8            # required by actor_out = Linear(128*6, ...)
L1 = SEQ - 3       # = 5, output length of the k=4 Conv1d
KPAD = 64          # stage-1 K: 48 input cols + 1 ones col (folded bias), padded to 64
OUT_PAD = 128      # lane-dense output: action(6) | score(1) | zeros(121)
BATCH = 200        # example batch (non-multiple of the tile to exercise padding)


def _default_batch_tile():
    """128 rows fills v5e's 4x128^2 MXU; 256 fills v6e/v7x's 2x256^2 MXU."""
    try:
        kind = jax.devices()[0].device_kind.lower()
    except Exception:
        return 128
    return 256 if ("v6" in kind or "v7" in kind) else 128


BT = _default_batch_tile()


# --------------------------------------------------------------------------------------
# Pallas kernel: three fused MXU matmuls + ReLU; weights resident, batch streamed.
# --------------------------------------------------------------------------------------
def a3c_kernel(x_ref, w_big, w_head, b_head, w_fin, b_fin, out_ref):
    relu = lambda v: jnp.maximum(v, 0.0)

    x = x_ref[...].astype(jnp.bfloat16)                                       # [BT, 64]

    # Stage 1: all six split branches in one matmul. The bias lives in row 48 of
    # w_big and is driven by the ones column of x, so no separate broadcast-add.
    merge = relu(jnp.dot(x, w_big[...],
                         preferred_element_type=jnp.float32))                 # [BT, 768]

    # Stage 2: actor + critic first head layers fused (256-wide RHS).
    h = relu(jnp.dot(merge.astype(jnp.bfloat16), w_head[...],
                     preferred_element_type=jnp.float32) + b_head[...])       # [BT, 256]

    # Stage 3: final actor(6) + critic(1) layers fused into one lane-dense [BT, 128].
    pre = jnp.dot(h.astype(jnp.bfloat16), w_fin[...],
                  preferred_element_type=jnp.float32) + b_fin[...]            # [BT, 128]
    col = jax.lax.broadcasted_iota(jnp.int32, pre.shape, 1)
    out_ref[...] = jnp.where(col < A_DIM, relu(pre), pre)   # ReLU only on action cols


# --------------------------------------------------------------------------------------
# Parameters (deterministic, PyTorch shapes), plus host-side folding/packing.
# --------------------------------------------------------------------------------------
def make_params(key):
    ks = iter(jax.random.split(key, 32))

    def xavier(shape, fan_in, fan_out):
        limit = (6.0 / (fan_in + fan_out)) ** 0.5
        return jax.random.uniform(next(ks), shape, jnp.float32, -limit, limit)

    def bias(n):
        return jax.random.normal(next(ks), (n,), jnp.float32) * 0.05

    p = {}
    p["fc1_w"] = xavier((HID, 1), 1, HID);            p["fc1_b"] = bias(HID)
    p["fc2_w"] = xavier((HID, 1), 1, HID);            p["fc2_b"] = bias(HID)
    p["fc3_w"] = xavier((HID, 1), 1, HID);            p["fc3_b"] = bias(HID)
    p["c1a_w"] = xavier((HID, 1, 4), 4, HID);         p["c1a_b"] = bias(HID)
    p["c1b_w"] = xavier((HID, HID, 5), HID * 5, HID); p["c1b_b"] = bias(HID)
    p["c2a_w"] = xavier((HID, 1, 4), 4, HID);         p["c2a_b"] = bias(HID)
    p["c2b_w"] = xavier((HID, HID, 5), HID * 5, HID); p["c2b_b"] = bias(HID)
    p["c3_w"] = xavier((HID, 1, A_DIM), A_DIM, HID);  p["c3_b"] = bias(HID)
    p["a1_w"] = xavier((HID, HID * 6), HID * 6, HID); p["a1_b"] = bias(HID)
    p["a2_w"] = xavier((A_DIM, HID), HID, A_DIM);     p["a2_b"] = bias(A_DIM)
    p["cr1_w"] = xavier((HID, HID * 6), HID * 6, HID); p["cr1_b"] = bias(HID)
    p["cr2_w"] = xavier((1, HID), HID, 1);            p["cr2_b"] = bias(1)
    return p


def prepare_kernel_weights(p):
    """One-time host-side packing: fold conv stacks, build the three fused matrices."""
    HID6 = HID * 6

    def fold_conv(wa, ba, wb, bb):
        # Conv1d(1,128,k=4) followed (no ReLU) by Conv1d(128,128,k=5), L_out == 1:
        #   out[o] = sum_j x[j] * W[j,o] + b[o]
        # wa: [128,1,4], ba: [128], wb: [128,128,5], bb: [128]
        wa_kc = wa[:, 0, :].T                          # [4(k), 128(c)]
        wb_tco = jnp.transpose(wb, (2, 1, 0))          # [5(t), 128(c), 128(o)]
        m = jnp.einsum("kc,tco->tko", wa_kc, wb_tco)   # [5, 4, 128]
        w = jnp.zeros((SEQ, HID), jnp.float32)
        for t in range(L1):                            # static, 5 iterations
            w = w.at[t:t + 4].add(m[t])                # W[t+k, o] += m[t, k, o]
        b = ba @ wb_tco.sum(axis=0) + bb               # [128]
        return w, b

    wc1, bc1 = fold_conv(p["c1a_w"], p["c1a_b"], p["c1b_w"], p["c1b_b"])
    wc2, bc2 = fold_conv(p["c2a_w"], p["c2a_b"], p["c2b_w"], p["c2b_b"])

    # --- stage 1: x_aug[B, 64] -> merge[B, 768] (split order 0..5, 128 each) ---
    # Rows 0..47 come from x (row = 8*channel + t); row 48 is the bias (ones column).
    w_big = jnp.zeros((KPAD, HID6), jnp.float32)
    w_big = w_big.at[0 * SEQ + SEQ - 1, 0 * HID:1 * HID].set(p["fc1_w"][:, 0])
    w_big = w_big.at[1 * SEQ + SEQ - 1, 1 * HID:2 * HID].set(p["fc2_w"][:, 0])
    w_big = w_big.at[2 * SEQ:3 * SEQ, 2 * HID:3 * HID].set(wc1)
    w_big = w_big.at[3 * SEQ:4 * SEQ, 3 * HID:4 * HID].set(wc2)
    w_big = w_big.at[4 * SEQ:4 * SEQ + A_DIM, 4 * HID:5 * HID].set(p["c3_w"][:, 0, :].T)
    w_big = w_big.at[5 * SEQ + SEQ - 1, 5 * HID:6 * HID].set(p["fc3_w"][:, 0])
    b_big = jnp.concatenate(
        [p["fc1_b"], p["fc2_b"], bc1, bc2, p["c3_b"], p["fc3_b"]])          # [768]
    w_big = w_big.at[6 * SEQ, :].set(b_big)            # folded stage-1 bias row

    # --- stage 2: merge[B,768] -> [ha | hc] [B,256] ---
    w_head = jnp.concatenate([p["a1_w"].T, p["cr1_w"].T], axis=1)           # [768, 256]
    b_head = jnp.concatenate([p["a1_b"], p["cr1_b"]])                       # [256]

    # --- stage 3: [ha | hc] [B,256] -> [action(6) | score(1) | zeros] [B,128] ---
    w_fin = jnp.zeros((2 * HID, OUT_PAD), jnp.float32)
    w_fin = w_fin.at[0:HID, 0:A_DIM].set(p["a2_w"].T)                       # [128, 6]
    w_fin = w_fin.at[HID:2 * HID, A_DIM:A_DIM + 1].set(p["cr2_w"].T)        # [128, 1]
    b_fin = jnp.zeros((OUT_PAD,), jnp.float32)
    b_fin = b_fin.at[0:A_DIM].set(p["a2_b"])
    b_fin = b_fin.at[A_DIM].set(p["cr2_b"][0])

    return (w_big.astype(jnp.bfloat16),
            w_head.astype(jnp.bfloat16), b_head[None, :],
            w_fin.astype(jnp.bfloat16), b_fin[None, :])


@jax.jit
def a3c_forward(x, kweights):
    B = x.shape[0]
    x_flat = x.reshape(B, 6 * SEQ)                       # [B, 48], row = 8*channel + t

    n_tiles = (B + BT - 1) // BT
    b_pad = n_tiles * BT

    # Pad the batch to a whole number of tiles, append the ones column that drives
    # the folded stage-1 bias, and zero-pad the K axis to 64.
    x_aug = jnp.zeros((b_pad, KPAD), x.dtype)
    x_aug = x_aug.at[:B, :6 * SEQ].set(x_flat)
    x_aug = x_aug.at[:, 6 * SEQ].set(1.0)

    w_big, w_head, b_head, w_fin, b_fin = kweights

    out = pl.pallas_call(
        a3c_kernel,
        out_shape=jax.ShapeDtypeStruct((b_pad, OUT_PAD), jnp.float32),
        grid_spec=pltpu.PrefetchScalarGridSpec(
            num_scalar_prefetch=0,
            grid=(n_tiles,),
            in_specs=[
                pl.BlockSpec((BT, KPAD), lambda b: (b, 0)),          # streamed x tile
                pl.BlockSpec((KPAD, 6 * HID), lambda b: (0, 0)),     # resident weights
                pl.BlockSpec((6 * HID, 2 * HID), lambda b: (0, 0)),
                pl.BlockSpec((1, 2 * HID), lambda b: (0, 0)),
                pl.BlockSpec((2 * HID, OUT_PAD), lambda b: (0, 0)),
                pl.BlockSpec((1, OUT_PAD), lambda b: (0, 0)),
            ],
            out_specs=pl.BlockSpec((BT, OUT_PAD), lambda b: (b, 0)), # streamed out tile
        ),
        compiler_params=pltpu.CompilerParams(
            dimension_semantics=("parallel",)),          # shard tiles across TCs (v7x)
    )(x_aug, w_big, w_head, b_head, w_fin, b_fin)

    action = out[:B, :A_DIM]
    score = out[:B, A_DIM:A_DIM + 1]
    return action, score


# --------------------------------------------------------------------------------------
# Plain-JAX reference (mirrors the PyTorch forward) for a correctness check.
# --------------------------------------------------------------------------------------
def a3c_reference(x, p):
    relu = lambda v: jnp.maximum(v, 0.0)
    dot = functools.partial(jnp.dot, precision=jax.lax.Precision.HIGHEST)
    linear = lambda v, w, b: dot(v, w.T) + b

    def conv1d(v, w, b):  # v: [B, Cin, L], w: [Cout, Cin, K]
        out = jax.lax.conv_general_dilated(
            v, w, (1,), "VALID", dimension_numbers=("NCH", "OIH", "NCH"),
            precision=jax.lax.Precision.HIGHEST)
        return out + b[None, :, None]

    B = x.shape[0]
    split0 = relu(linear(x[:, 0, -1:], p["fc1_w"], p["fc1_b"]))
    split1 = relu(linear(x[:, 1, -1:], p["fc2_w"], p["fc2_b"]))
    split5 = relu(linear(x[:, 5, -1:], p["fc3_w"], p["fc3_b"]))
    y = conv1d(conv1d(x[:, 2:3, :], p["c1a_w"], p["c1a_b"]), p["c1b_w"], p["c1b_b"])
    split2 = relu(y).reshape(B, -1)
    y = conv1d(conv1d(x[:, 3:4, :], p["c2a_w"], p["c2a_b"]), p["c2b_w"], p["c2b_b"])
    split3 = relu(y).reshape(B, -1)
    split4 = relu(conv1d(x[:, 4:5, :A_DIM], p["c3_w"], p["c3_b"])).reshape(B, -1)
    merge = jnp.concatenate([split0, split1, split2, split3, split4, split5], axis=1)
    ha = relu(linear(merge, p["a1_w"], p["a1_b"]))
    action = relu(linear(ha, p["a2_w"], p["a2_b"]))
    hc = relu(linear(merge, p["cr1_w"], p["cr1_b"]))
    score = linear(hc, p["cr2_w"], p["cr2_b"])
    return action, score


if __name__ == "__main__":
    key = jax.random.PRNGKey(0)
    kx, kp = jax.random.split(key)
    x = jax.random.normal(kx, (BATCH, 6, SEQ), jnp.float32)
    params = make_params(kp)
    kweights = prepare_kernel_weights(params)   # one-time fold/pack (not per-call)

    action, score = a3c_forward(x, kweights)
    jax.block_until_ready((action, score))

    ref_action, ref_score = a3c_reference(x, params)
    assert action.shape == (BATCH, A_DIM) and score.shape == (BATCH, 1)
    # tolerance loosened vs f32-only math to cover bf16 MXU operands at B=200
    assert jnp.allclose(action, ref_action, atol=5e-2, rtol=5e-2)
    assert jnp.allclose(score, ref_score, atol=5e-2, rtol=5e-2)
    print("KERNEL_OK")
</pallas_src>

<mosaic_0001>
module attributes {stable_mosaic.version = 11 : i64} {
  func.func @a3c_kernel(%arg0: i32, %arg1: memref<128x64xf32, #tpu.memory_space<vmem>>, %arg2: memref<64x768xbf16, #tpu.memory_space<vmem>>, %arg3: memref<768x256xbf16, #tpu.memory_space<vmem>>, %arg4: memref<1x256xf32, #tpu.memory_space<vmem>>, %arg5: memref<256x128xbf16, #tpu.memory_space<vmem>>, %arg6: memref<1x128xf32, #tpu.memory_space<vmem>>, %arg7: memref<128x128xf32, #tpu.memory_space<vmem>>) attributes {dimension_semantics = [#tpu.dimension_semantics<parallel>], iteration_bounds = array<i64: 2>, scalar_prefetch = 0 : i64, scratch_operands = 0 : i64, tpu.core_type = #tpu.core_type<tc>, window_params = [{transform_indices = @transform_0, window_bounds = array<i64: 128, 64>}, {pipeline_mode = #tpu.pipeline_mode<synchronous>, transform_indices = @transform_1, window_bounds = array<i64: 64, 768>}, {pipeline_mode = #tpu.pipeline_mode<synchronous>, transform_indices = @transform_2, window_bounds = array<i64: 768, 256>}, {pipeline_mode = #tpu.pipeline_mode<synchronous>, transform_indices = @transform_3, window_bounds = array<i64: 1, 256>}, {pipeline_mode = #tpu.pipeline_mode<synchronous>, transform_indices = @transform_4, window_bounds = array<i64: 256, 128>}, {pipeline_mode = #tpu.pipeline_mode<synchronous>, transform_indices = @transform_5, window_bounds = array<i64: 1, 128>}, {transform_indices = @transform_6, window_bounds = array<i64: 128, 128>}]} {
    %c0 = arith.constant 0 : index
    %c0_0 = arith.constant 0 : index
    %0 = vector.load %arg1[%c0, %c0_0] : memref<128x64xf32, #tpu.memory_space<vmem>>, vector<128x64xf32>
    %1 = arith.truncf %0 : vector<128x64xf32> to vector<128x64xbf16>
    %c0_1 = arith.constant 0 : index
    %c0_2 = arith.constant 0 : index
    %2 = vector.load %arg2[%c0_1, %c0_2] : memref<64x768xbf16, #tpu.memory_space<vmem>>, vector<64x768xbf16>
    %cst = arith.constant dense<0.000000e+00> : vector<128x768xf32>
    %3 = tpu.matmul %1, %2, %cst {dimension_numbers = #tpu.dot_dimension_numbers<[1], [0], [0], [1], [0, 0, 1, 1], [], []>} : vector<128x64xbf16>, vector<64x768xbf16>, vector<128x768xf32> -> vector<128x768xf32>
    %cst_3 = arith.constant 0.000000e+00 : f32
    %4 = vector.broadcast %cst_3 : f32 to vector<128x768xf32>
    %5 = arith.maximumf %3, %4 : vector<128x768xf32>
    %6 = arith.truncf %5 : vector<128x768xf32> to vector<128x768xbf16>
    %c0_4 = arith.constant 0 : index
    %c0_5 = arith.constant 0 : index
    %7 = vector.load %arg3[%c0_4, %c0_5] : memref<768x256xbf16, #tpu.memory_space<vmem>>, vector<768x256xbf16>
    %cst_6 = arith.constant dense<0.000000e+00> : vector<128x256xf32>
    %8 = tpu.matmul %6, %7, %cst_6 {dimension_numbers = #tpu.dot_dimension_numbers<[1], [0], [0], [1], [0, 0, 1, 1], [], []>} : vector<128x768xbf16>, vector<768x256xbf16>, vector<128x256xf32> -> vector<128x256xf32>
    %c0_7 = arith.constant 0 : index
    %c0_8 = arith.constant 0 : index
    %9 = vector.load %arg4[%c0_7, %c0_8] : memref<1x256xf32, #tpu.memory_space<vmem>>, vector<1x256xf32>
    %10 = vector.broadcast %9 : vector<1x256xf32> to vector<128x256xf32>
    %11 = arith.addf %8, %10 : vector<128x256xf32>
    %cst_9 = arith.constant 0.000000e+00 : f32
    %12 = vector.broadcast %cst_9 : f32 to vector<128x256xf32>
    %13 = arith.maximumf %11, %12 : vector<128x256xf32>
    %14 = arith.truncf %13 : vector<128x256xf32> to vector<128x256xbf16>
    %c0_10 = arith.constant 0 : index
    %c0_11 = arith.constant 0 : index
    %15 = vector.load %arg5[%c0_10, %c0_11] : memref<256x128xbf16, #tpu.memory_space<vmem>>, vector<256x128xbf16>
    %cst_12 = arith.constant dense<0.000000e+00> : vector<128x128xf32>
    %16 = tpu.matmul %14, %15, %cst_12 {dimension_numbers = #tpu.dot_dimension_numbers<[1], [0], [0], [1], [0, 0, 1, 1], [], []>} : vector<128x256xbf16>, vector<256x128xbf16>, vector<128x128xf32> -> vector<128x128xf32>
    %c0_13 = arith.constant 0 : index
    %c0_14 = arith.constant 0 : index
    %17 = vector.load %arg6[%c0_13, %c0_14] : memref<1x128xf32, #tpu.memory_space<vmem>>, vector<1x128xf32>
    %18 = vector.broadcast %17 : vector<1x128xf32> to vector<128x128xf32>
    %19 = arith.addf %16, %18 : vector<128x128xf32>
    %20 = tpu.iota {dimensions = array<i32: 1>} : vector<128x128xi32>
    %c6_i32 = arith.constant 6 : i32
    %21 = vector.broadcast %c6_i32 : i32 to vector<128x128xi32>
    %22 = arith.cmpi slt, %20, %21 : vector<128x128xi32>
    %cst_15 = arith.constant 0.000000e+00 : f32
    %23 = vector.broadcast %cst_15 : f32 to vector<128x128xf32>
    %24 = arith.maximumf %19, %23 : vector<128x128xf32>
    %25 = arith.select %22, %24, %19 : vector<128x128xi1>, vector<128x128xf32>
    %c0_16 = arith.constant 0 : index
    %c0_17 = arith.constant 0 : index
    %26 = vector.load %arg7[%c0_16, %c0_17] : memref<128x128xf32, #tpu.memory_space<vmem>>, vector<128x128xf32>
    tpu.vector_store %arg7[%c0_16, %c0_17], %25 {strides = array<i32>} : memref<128x128xf32, #tpu.memory_space<vmem>>, vector<128x128xf32>,
    return
  }
  func.func @transform_0(%arg0: i32) -> (i32, i32) {
    %c0_i32 = arith.constant 0 : i32
    %c0_i32_0 = arith.constant 0 : i32
    return %arg0, %c0_i32 : i32, i32
  }
  func.func @transform_1(%arg0: i32) -> (i32, i32) {
    %c0_i32 = arith.constant 0 : i32
    %c0_i32_0 = arith.constant 0 : i32
    %c0_i32_1 = arith.constant 0 : i32
    return %c0_i32, %c0_i32_0 : i32, i32
  }
  func.func @transform_2(%arg0: i32) -> (i32, i32) {
    %c0_i32 = arith.constant 0 : i32
    %c0_i32_0 = arith.constant 0 : i32
    %c0_i32_1 = arith.constant 0 : i32
    return %c0_i32, %c0_i32_0 : i32, i32
  }
  func.func @transform_3(%arg0: i32) -> (i32, i32) {
    %c0_i32 = arith.constant 0 : i32
    %c0_i32_0 = arith.constant 0 : i32
    %c0_i32_1 = arith.constant 0 : i32
    return %c0_i32, %c0_i32_0 : i32, i32
  }
  func.func @transform_4(%arg0: i32) -> (i32, i32) {
    %c0_i32 = arith.constant 0 : i32
    %c0_i32_0 = arith.constant 0 : i32
    %c0_i32_1 = arith.constant 0 : i32
    return %c0_i32, %c0_i32_0 : i32, i32
  }
  func.func @transform_5(%arg0: i32) -> (i32, i32) {
    %c0_i32 = arith.constant 0 : i32
    %c0_i32_0 = arith.constant 0 : i32
    %c0_i32_1 = arith.constant 0 : i32
    return %c0_i32, %c0_i32_0 : i32, i32
  }
  func.func @transform_6(%arg0: i32) -> (i32, i32) {
    %c0_i32 = arith.constant 0 : i32
    %c0_i32_0 = arith.constant 0 : i32
    return %arg0, %c0_i32 : i32, i32
  }
}

</mosaic_0001>

<bundles_post_ra>
// kernel: a3c_forward.1
= control target key start
LH: loop header
LB: loop body
LE: loop exit
PB: predicated region body
PF: predicated region fallthrough
CT: control target
= control target key end

     0   :  { %s3234_s21 = smov 0   ;;  %s4697_s0 = inlined_call_operand.vmem [shape: f32[256,64], index: 0, kind: input, shape index: {}]   ;;  %s4698_s1 = inlined_call_operand.vmem [shape: bf16[64,768], index: 1, kind: input, shape index: {}]   ;;  %s4699_s2 = inlined_call_operand.vmem [shape: bf16[768,256], index: 2, kind: input, shape index: {}]   ;;  %s4700_s3 = inlined_call_operand.vmem [shape: f32[1,256], index: 3, kind: input, shape index: {}]   ;;  %s4701_s4 = inlined_call_operand.vmem [shape: bf16[256,128], index: 4, kind: input, shape index: {}]   ;;  %s4702_s5 = inlined_call_operand.vmem [shape: f32[1,128], index: 5, kind: input, shape index: {}]   ;;  %s4703_s6 = inlined_call_operand.vmem [shape: f32[256,128], index: 6, kind: output, shape index: {}]  }
   0x1 LB: > { %s2442_s22 = sadd.s32 4294967295, %s3197_s21   ;;  %p2446_p0 = scmp.ge.s32.totalorder %s3197_s21, 1  ;;  %s3197_s21 = sphi %s3234_s21, %s16_s21  }
   0x2   : > { %p213_p1 = scmp.lt.s32.totalorder %s3197_s21, 3 }
   0x4   : > { %p214_p2 = pnand %p2446_p0, %p213_p1 }
   0x6   : > { %217 = sbr.rel (%p214_p2) target bundleno = 941 (0x3ad), region = 44 }
   0xb   : > { %v2525_v0 = vld [vmem:[%s4698_s1 + $0x90] sm:$0xf]  ;;  %v3066_v1 = vld [vmem:[%s4698_s1 + $0xa4] sm:$0xf0]  ;;  %v3063_v2 = vld [vmem:[%s4698_s1 + $0x94] sm:$0xf] }
   0xc   : > { %v2526_v3 = vor.u32 %v3066_v1, %v2525_v0  ;;  %v2527_v4 = vld [vmem:[%s4698_s1 + $0xa8] sm:$0xf0]  ;;  %v2501_v5 = vld [vmem:[%s4698_s1 + $0x60] sm:$0xf]  ;;  %v3060_v6 = vld [vmem:[%s4698_s1 + $0x74] sm:$0xf0] }
   0xd   : > { %v2530_v7 = vor.u32 %v3063_v2, %v2527_v4  ;;  %v3057_v8 = vld [vmem:[%s4698_s1 + $0x64] sm:$0xf]  ;;  %v2503_v9 = vld [vmem:[%s4698_s1 + $0x78] sm:$0xf0]  ;;  %v2502_v10 = vor.u32 %v3060_v6, %v2501_v5  ;;  %v2477_v11 = vld [vmem:[%s4698_s1 + $0x30] sm:$0xf] }
   0xe   : > { %453 = vmatpush.bf16.msra.mxu0 %v2526_v3  ;;  %v3054_v12 = vld [vmem:[%s4698_s1 + $0x44] sm:$0xf0]  ;;  %v2506_v13 = vor.u32 %v3057_v8, %v2503_v9  ;;  %v2533_v14 = vld [vmem:[%s4698_s1 + $0x98] sm:$0xf]  ;;  %v3067_v15 = vld [vmem:[%s4698_s1 + $0xac] sm:$0xf0] }
   0xf   : > { %502 = vmatpush.bf16.msra.mxu1 %v2530_v7  ;;  %v3064_v16 = vld [vmem:[%s4698_s1 + $0x9c] sm:$0xf]  ;;  %v3051_v17 = vld [vmem:[%s4698_s1 + $0x34] sm:$0xf]  ;;  %v2479_v18 = vld [vmem:[%s4698_s1 + $0x48] sm:$0xf0]  ;;  %v2534_v19 = vor.u32 %v3067_v15, %v2533_v14  ;;  %v2478_v25 = vor.u32 %v3054_v12, %v2477_v11 }
  0x10   : > { %v2535_v20 = vld [vmem:[%s4698_s1 + $0xb0] sm:$0xf0]  ;;  %v2453_v22 = vld [vmem:[%s4698_s1] sm:$0xf]  ;;  %v3048_v23 = vld [vmem:[%s4698_s1 + $0x14] sm:$0xf0]  ;;  %v2482_v31 = vor.u32 %v3051_v17, %v2479_v18 }
  0x11   : > { %v2538_v21 = vor.u32 %v3064_v16, %v2535_v20  ;;  %v2509_v24 = vld [vmem:[%s4698_s1 + $0x68] sm:$0xf]  ;;  %551 = vmatpush.bf16.msra.mxu2 %v2534_v19  ;;  %v3045_v26 = vld [vmem:[%s4698_s1 + $0x4] sm:$0xf]  ;;  %v2455_v27 = vld [vmem:[%s4698_s1 + $0x18] sm:$0xf0]  ;;  %v2454_v41 = vor.u32 %v3048_v23, %v2453_v22 }
  0x12   : > { %454 = vmatpush.bf16.msra.mxu0 %v2502_v10  ;;  %v3061_v28 = vld [vmem:[%s4698_s1 + $0x7c] sm:$0xf0]  ;;  %v3058_v29 = vld [vmem:[%s4698_s1 + $0x6c] sm:$0xf]  ;;  %v2511_v30 = vld [vmem:[%s4698_s1 + $0x80] sm:$0xf0]  ;;  %v2458_v44 = vor.u32 %v3045_v26, %v2455_v27 }
  0x13   : > { %503 = vmatpush.bf16.msra.mxu1 %v2506_v13  ;;  %600 = vmatpush.bf16.msra.mxu3 %v2538_v21  ;;  %v2510_v32 = vor.u32 %v3061_v28, %v2509_v24  ;;  %v2514_v33 = vor.u32 %v3058_v29, %v2511_v30  ;;  %s2447_s27 = sshll.u32 %s2442_s22, 4  ;;  %v2541_v34 = vld [vmem:[%s4698_s1 + $0xa0] sm:$0xf]  ;;  %v3068_v35 = vld [vmem:[%s4698_s1 + $0xb4] sm:$0xf0]  ;;  %vm424_vm0 = vcmask 523264  }
  0x14   : > { %p244_p3 = scmp.lt.s32.totalorder %s2447_s27, 31  ;;  %v3065_v36 = vld [vmem:[%s4698_s1 + $0xa4] sm:$0xf]  ;;  %v2543_v37 = vld [vmem:[%s4698_s1 + $0xb8] sm:$0xf0]  ;;  %v2542_v45 = vor.u32 %v3068_v35, %v2541_v34 }
  0x15   : > { %v2485_v38 = vld [vmem:[%s4698_s1 + $0x38] sm:$0xf]  ;;  %v3055_v39 = vld [vmem:[%s4698_s1 + $0x4c] sm:$0xf0]  ;;  %v3052_v40 = vld [vmem:[%s4698_s1 + $0x3c] sm:$0xf]  ;;  %552 = vmatpush.bf16.msra.mxu2 %v2510_v32  ;;  %v2546_v48 = vor.u32 %v3065_v36, %v2543_v37 }
  0x16   : > { %455 = vmatpush.bf16.msra.mxu0 %v2478_v25  ;;  %s4750_s27 = smov (!%p244_p3, %s2447_s27), 31  ;;  %v2486_v42 = vor.u32 %v3055_v39, %v2485_v38  ;;  %v2487_v43 = vld [vmem:[%s4698_s1 + $0x50] sm:$0xf0]  ;;  %v2461_v46 = vld [vmem:[%s4698_s1 + $0x8] sm:$0xf] }
  0x17   : > { %504 = vmatpush.bf16.msra.mxu1 %v2482_v31  ;;  %601 = vmatpush.bf16.msra.mxu3 %v2514_v33  ;;  %v3049_v47 = vld [vmem:[%s4698_s1 + $0x1c] sm:$0xf0]  ;;  %s2448_s25 = sshll.u32 %s4750_s27, 3  ;;  %v2490_v49 = vor.u32 %v3052_v40, %v2487_v43  ;;  %v3046_v50 = vld [vmem:[%s4698_s1 + $0xc] sm:$0xf] }
  0x18   : > { %s3354_s29 = scalar_lea.vmem %s4697_s0, %s2448_s25  ;;  %v2463_v51 = vld [vmem:[%s4698_s1 + $0x20] sm:$0xf0]  ;;  %v2462_v54 = vor.u32 %v3049_v47, %v2461_v46  ;;  %v2517_v57 = vld [vmem:[%s4698_s1 + $0x70] sm:$0xf]  ;;  %v3062_v58 = vld [vmem:[%s4698_s1 + $0x84] sm:$0xf0]  ;;  %s4629_s20 = scalar_lea.vmem %s4703_s6, %s2448_s25 }
  0x19   : > { %v256_v52 = vld [vmem:[%s3354_s29] sm:$0xff]  ;;  %v257_v53 = vld [vmem:[%s3354_s29 + $0x8] sm:$0xff]  ;;  %553 = vmatpush.bf16.msra.mxu2 %v2486_v42  ;;  %v2466_v56 = vor.u32 %v3046_v50, %v2463_v51  ;;  %v3059_v59 = vld [vmem:[%s4698_s1 + $0x74] sm:$0xf]  ;;  %v2518_v60 = vor.u32 %v3062_v58, %v2517_v57 }
  0x1a   : > { %456 = vmatpush.bf16.msra.mxu0 %v2454_v41  ;;  %v3364_v55 = vpack.c.bf16 %v257_v53, %v256_v52  ;;  %v2519_v61 = vld [vmem:[%s4698_s1 + $0x88] sm:$0xf0]  ;;  %v258_v63 = vld [vmem:[%s3354_s29 + $0x10] sm:$0xff]  ;;  %v259_v0 = vld [vmem:[%s3354_s29 + $0x18] sm:$0xff] }
  0x1b   : > { %505 = vmatpush.bf16.msra.mxu1 %v2458_v44  ;;  %602 = vmatpush.bf16.msra.mxu3 %v2490_v49  ;;  %v2522_v62 = vor.u32 %v3059_v59, %v2519_v61  ;;  %v3388_v1 = vpack.c.bf16 %v259_v0, %v258_v63  ;;  %v260_v2 = vld [vmem:[%s3354_s29 + $0x20] sm:$0xff]  ;;  %v261_v3 = vld [vmem:[%s3354_s29 + $0x28] sm:$0xff]  ;;  %v3056_v6 = vld [vmem:[%s4698_s1 + $0x54] sm:$0xf0] }
  0x1c   : > { %v3400_v4 = vpack.c.bf16 %v261_v3, %v260_v2  ;;  %v2493_v5 = vld [vmem:[%s4698_s1 + $0x40] sm:$0xf]  ;;  %v3053_v7 = vld [vmem:[%s4698_s1 + $0x44] sm:$0xf]  ;;  %v2495_v9 = vld [vmem:[%s4698_s1 + $0x58] sm:$0xf0] }
  0x1d   : > { %2547 = vmatmul.msk.bf16.vlgmr.msra.gmra.mxu0 %vm424_vm0, %v3364_v55  ;;  %554 = vmatpush.bf16.msra.mxu2 %v2462_v54  ;;  %v2494_v8 = vor.u32 %v3056_v6, %v2493_v5  ;;  %v2498_v10 = vor.u32 %v3053_v7, %v2495_v9  ;;  %v262_v11 = vld [vmem:[%s3354_s29 + $0x30] sm:$0xff]  ;;  %v263_v12 = vld [vmem:[%s3354_s29 + $0x38] sm:$0xff]  ;;  %v264_v14 = vld [vmem:[%s3354_s29 + $0x40] sm:$0xff] }
  0x1e   : > { %649 = vmatpush.bf16.msrb.mxu0 %v2542_v45  ;;  %2555 = vmatmul.msk.bf16.vlgmr.msra.gmra.mxu1 %vm424_vm0, %v3364_v55  ;;  %v3424_v13 = vpack.c.bf16 %v263_v12, %v262_v11  ;;  %v265_v15 = vld [vmem:[%s3354_s29 + $0x48] sm:$0xff]  ;;  %v2469_v17 = vld [vmem:[%s4698_s1 + $0x10] sm:$0xf]  ;;  %v3047_v19 = vld [vmem:[%s4698_s1 + $0x14] sm:$0xf] }
  0x1f   : > { %698 = vmatpush.bf16.msrb.mxu1 %v2546_v48  ;;  %603 = vmatpush.bf16.msra.mxu3 %v2466_v56  ;;  %v3436_v16 = vpack.c.bf16 %v265_v15, %v264_v14  ;;  %v3050_v18 = vld [vmem:[%s4698_s1 + $0x24] sm:$0xf0]  ;;  %v2471_v21 = vld [vmem:[%s4698_s1 + $0x28] sm:$0xf0]  ;;  %v2653_v23 = vld [vmem:[%s4699_s2 + $0x70] sm:$0xf] }
  0x20   : > { %2563 = vmatmul.msk.bf16.vlgmr.msra.gmra.mxu2 %vm424_vm0, %v3364_v55  ;;  %v2470_v20 = vor.u32 %v3050_v18, %v2469_v17  ;;  %v2474_v22 = vor.u32 %v3047_v19, %v2471_v21  ;;  %v3084_v24 = vld [vmem:[%s4699_s2 + $0x74] sm:$0xf0]  ;;  %v2717_v25 = vld [vmem:[%s4699_s2 + $0xf0] sm:$0xf]  ;;  %v2645_v28 = vld [vmem:[%s4699_s2 + $0x60] sm:$0xf] }
  0x21   : > { %v2654_v26 = vor.u32 %v3084_v24, %v2653_v23  ;;  %v3100_v27 = vld [vmem:[%s4699_s2 + $0xf4] sm:$0xf0]  ;;  %v3082_v29 = vld [vmem:[%s4699_s2 + $0x64] sm:$0xf0]  ;;  %v2709_v31 = vld [vmem:[%s4699_s2 + $0xe0] sm:$0xf] }
  0x22   : > { %650 = vmatpush.bf16.msrb.mxu0 %v2518_v60  ;;  %2571 = vmatmul.msk.bf16.vlgmr.msra.gmra.mxu3 %vm424_vm0, %v3364_v55  ;;  %v2718_v30 = vor.u32 %v3100_v27, %v2717_v25  ;;  %v3098_v32 = vld [vmem:[%s4699_s2 + $0xe4] sm:$0xf0]  ;;  %v266_v33 = vld [vmem:[%s3354_s29 + $0x50] sm:$0xff]  ;;  %v267_v34 = vld [vmem:[%s3354_s29 + $0x58] sm:$0xff]  ;;  %v2646_v35 = vor.u32 %v3082_v29, %v2645_v28 }
  0x23   : > { %699 = vmatpush.bf16.msrb.mxu1 %v2522_v62  ;;  %1469 = vmatpush.bf16.msrb.mxu2 %v2654_v26  ;;  %v2710_v36 = vor.u32 %v3098_v32, %v2709_v31  ;;  %v3484_v37 = vpack.c.bf16 %v267_v34, %v266_v33  ;;  %v2637_v38 = vld [vmem:[%s4699_s2 + $0x50] sm:$0xf]  ;;  %v3080_v39 = vld [vmem:[%s4699_s2 + $0x54] sm:$0xf0]  ;;  %v2629_v43 = vld [vmem:[%s4699_s2 + $0x40] sm:$0xf] }
  0x24   : > { %1518 = vmatpush.bf16.msrb.mxu3 %v2718_v30  ;;  %v2701_v40 = vld [vmem:[%s4699_s2 + $0xd0] sm:$0xf]  ;;  %v2638_v41 = vor.u32 %v3080_v39, %v2637_v38  ;;  %v3096_v42 = vld [vmem:[%s4699_s2 + $0xd4] sm:$0xf0]  ;;  %v3078_v44 = vld [vmem:[%s4699_s2 + $0x44] sm:$0xf0] }
  0x25   : > { %v2702_v45 = vor.u32 %v3096_v42, %v2701_v40  ;;  %v2693_v46 = vld [vmem:[%s4699_s2 + $0xc0] sm:$0xf]  ;;  %v3094_v47 = vld [vmem:[%s4699_s2 + $0xc4] sm:$0xf0]  ;;  %v2630_v48 = vor.u32 %v3078_v44, %v2629_v43  ;;  %v2621_v50 = vld [vmem:[%s4699_s2 + $0x30] sm:$0xf] }
  0x26   : > { %651 = vmatpush.bf16.msrb.mxu0 %v2494_v8  ;;  %v2694_v49 = vor.u32 %v3094_v47, %v2693_v46  ;;  %v3076_v51 = vld [vmem:[%s4699_s2 + $0x34] sm:$0xf0]  ;;  %v2685_v52 = vld [vmem:[%s4699_s2 + $0xb0] sm:$0xf]  ;;  %v268_v54 = vld [vmem:[%s3354_s29 + $0x60] sm:$0xff] }
  0x27   : > { %700 = vmatpush.bf16.msrb.mxu1 %v2498_v10  ;;  %1470 = vmatpush.bf16.msrb.mxu2 %v2646_v35  ;;  %v3092_v53 = vld [vmem:[%s4699_s2 + $0xb4] sm:$0xf0]  ;;  %v269_v56 = vld [vmem:[%s3354_s29 + $0x68] sm:$0xff]  ;;  %v2622_v57 = vor.u32 %v3076_v51, %v2621_v50  ;;  %v2613_v60 = vld [vmem:[%s4699_s2 + $0x20] sm:$0xf] }
  0x28   : > { %1519 = vmatpush.bf16.msrb.mxu3 %v2710_v36  ;;  %v2686_v58 = vor.u32 %v3092_v53, %v2685_v52  ;;  %v3532_v59 = vpack.c.bf16 %v269_v56, %v268_v54  ;;  %v3074_v61 = vld [vmem:[%s4699_s2 + $0x24] sm:$0xf0]  ;;  %v2677_v62 = vld [vmem:[%s4699_s2 + $0xa0] sm:$0xf]  ;;  %v2781_v3 = vld [vmem:[%s4699_s2 + $0x170] sm:$0xf] }
  0x29   : > { %v2614_v63 = vor.u32 %v3074_v61, %v2613_v60  ;;  %v3090_v0 = vld [vmem:[%s4699_s2 + $0xa4] sm:$0xf0]  ;;  %v3116_v5 = vld [vmem:[%s4699_s2 + $0x174] sm:$0xf0]  ;;  %v2845_v6 = vld [vmem:[%s4699_s2 + $0x1f0] sm:$0xf] }
  0x2a   : > { %652 = vmatpush.bf16.msrb.mxu0 %v2470_v20  ;;  %v2678_v2 = vor.u32 %v3090_v0, %v2677_v62  ;;  %v2782_v7 = vor.u32 %v3116_v5, %v2781_v3  ;;  %v3132_v8 = vld [vmem:[%s4699_s2 + $0x1f4] sm:$0xf0]  ;;  %v2605_v9 = vld [vmem:[%s4699_s2 + $0x10] sm:$0xf]  ;;  %v2597_v18 = vld [vmem:[%s4699_s2] sm:$0xf] }
  0x2b   : > { %701 = vmatpush.bf16.msrb.mxu1 %v2474_v22  ;;  %1471 = vmatpush.bf16.msrb.mxu2 %v2638_v41  ;;  %v3072_v10 = vld [vmem:[%s4699_s2 + $0x14] sm:$0xf0]  ;;  %v2846_v11 = vor.u32 %v3132_v8, %v2845_v6  ;;  %v2669_v14 = vld [vmem:[%s4699_s2 + $0x90] sm:$0xf]  ;;  %v3070_v19 = vld [vmem:[%s4699_s2 + $0x4] sm:$0xf0] }
  0x2c   : > { %1520 = vmatpush.bf16.msrb.mxu3 %v2702_v45  ;;  %v2606_v12 = vor.u32 %v3072_v10, %v2605_v9  ;;  %v3088_v15 = vld [vmem:[%s4699_s2 + $0x94] sm:$0xf0]  ;;  %v2661_v20 = vld [vmem:[%s4699_s2 + $0x80] sm:$0xf]  ;;  %v2598_v21 = vor.u32 %v3070_v19, %v2597_v18  ;;  %v3086_v22 = vld [vmem:[%s4699_s2 + $0x84] sm:$0xf0] }
  0x2d   : > { %2548 = vmatmul.msk.bf16.gmra.mxu0 %vm424_vm0, %v3388_v1  ;;  %v2670_v17 = vor.u32 %v3088_v15, %v2669_v14  ;;  %v2662_v23 = vor.u32 %v3086_v22, %v2661_v20  ;;  %v270_v24 = vld [vmem:[%s3354_s29 + $0x70] sm:$0xff]  ;;  %v271_v25 = vld [vmem:[%s3354_s29 + $0x78] sm:$0xff]  ;;  %v2773_v27 = vld [vmem:[%s4699_s2 + $0x160] sm:$0xf] }
  0x2e   : > { %2556 = vmatmul.msk.bf16.gmra.mxu1 %vm424_vm0, %v3388_v1  ;;  %1567 = vmatpush.bf16.msra.mxu0 %v2782_v7  ;;  %v3592_v26 = vpack.c.bf16 %v271_v25, %v270_v24  ;;  %v3114_v28 = vld [vmem:[%s4699_s2 + $0x164] sm:$0xf0]  ;;  %v2837_v29 = vld [vmem:[%s4699_s2 + $0x1e0] sm:$0xf]  ;;  %v2765_v35 = vld [vmem:[%s4699_s2 + $0x150] sm:$0xf] }
  0x2f   : > { %1472 = vmatpush.bf16.msrb.mxu2 %v2630_v48  ;;  %1616 = vmatpush.bf16.msra.mxu1 %v2846_v11  ;;  %v2774_v30 = vor.u32 %v3114_v28, %v2773_v27  ;;  %v3130_v31 = vld [vmem:[%s4699_s2 + $0x1e4] sm:$0xf0]  ;;  %v3112_v36 = vld [vmem:[%s4699_s2 + $0x154] sm:$0xf0]  ;;  %v2829_v38 = vld [vmem:[%s4699_s2 + $0x1d0] sm:$0xf] }
  0x30   : > { %2564 = vmatmul.msk.bf16.gmra.mxu2 %vm424_vm0, %v3388_v1  ;;  %1521 = vmatpush.bf16.msrb.mxu3 %v2694_v49  ;;  %v2838_v32 = vor.u32 %v3130_v31, %v2837_v29  ;;  %v2766_v39 = vor.u32 %v3112_v36, %v2765_v35  ;;  %v3128_v40 = vld [vmem:[%s4699_s2 + $0x1d4] sm:$0xf0]  ;;  %v2757_v56 = vld [vmem:[%s4699_s2 + $0x140] sm:$0xf]  ;;  %v3126_v61 = vld [vmem:[%s4699_s2 + $0x1c4] sm:$0xf0] }
  0x31   : > { %v2830_v41 = vor.u32 %v3128_v40, %v2829_v38  ;;  %v2749_v15 = vld [vmem:[%s4699_s2 + $0x130] sm:$0xf]  ;;  %v3124_v20 = vld [vmem:[%s4699_s2 + $0x1b4] sm:$0xf0]  ;;  %v2741_v36 = vld [vmem:[%s4699_s2 + $0x120] sm:$0xf] }
  0x32   : > { %2572 = vmatmul.msk.bf16.gmra.mxu3 %vm424_vm0, %v3388_v1  ;;  %1568 = vmatpush.bf16.msra.mxu0 %v2774_v30  ;;  %v2813_v18 = vld [vmem:[%s4699_s2 + $0x1b0] sm:$0xf]  ;;  %v3106_v38 = vld [vmem:[%s4699_s2 + $0x124] sm:$0xf0] }
  0x33   : > { %1473 = vmatpush.bf16.msrb.mxu2 %v2622_v57  ;;  %1617 = vmatpush.bf16.msra.mxu1 %v2838_v32  ;;  %v3110_v57 = vld [vmem:[%s4699_s2 + $0x144] sm:$0xf0]  ;;  %v2742_v40 = vor.u32 %v3106_v38, %v2741_v36  ;;  %v2901_v36 = vld [vmem:[%s4699_s2 + $0x260] sm:$0xf] }
  0x34   : > { %1522 = vmatpush.bf16.msrb.mxu3 %v2686_v58  ;;  %v2821_v58 = vld [vmem:[%s4699_s2 + $0x1c0] sm:$0xf]  ;;  %v2758_v60 = vor.u32 %v3110_v57, %v2757_v56  ;;  %v3146_v38 = vld [vmem:[%s4699_s2 + $0x264] sm:$0xf0] }
  0x36   : > { %1569 = vmatpush.bf16.msra.mxu0 %v2766_v39  ;;  %v2805_v39 = vld [vmem:[%s4699_s2 + $0x1a0] sm:$0xf] }
  0x37   : > { %1474 = vmatpush.bf16.msrb.mxu2 %v2614_v63  ;;  %1618 = vmatpush.bf16.msra.mxu1 %v2830_v41  ;;  %v3122_v41 = vld [vmem:[%s4699_s2 + $0x1a4] sm:$0xf0] }
  0x38   : > { %1523 = vmatpush.bf16.msrb.mxu3 %v2678_v2 }
  0x3a   : > { %1570 = vmatpush.bf16.msra.mxu0 %v2758_v60 }
  0x3b   : > { %1475 = vmatpush.bf16.msrb.mxu2 %v2606_v12 }
  0x3c   : > { %1524 = vmatpush.bf16.msrb.mxu3 %v2670_v17  ;;  %v3108_v17 = vld [vmem:[%s4699_s2 + $0x134] sm:$0xf0] }
  0x3d   : > { %2549 = vmatmul.msk.bf16.gmra.mxu0 %vm424_vm0, %v3400_v4  ;;  %v2750_v19 = vor.u32 %v3108_v17, %v2749_v15 }
  0x3e   : > { %2557 = vmatmul.msk.bf16.gmra.mxu1 %vm424_vm0, %v3400_v4 }
  0x3f   : > { %1476 = vmatpush.bf16.msrb.mxu2 %v2598_v21  ;;  %1571 = vmatpush.bf16.msra.mxu0 %v2750_v19 }
  0x40   : > { %2565 = vmatmul.msk.bf16.gmra.mxu2 %vm424_vm0, %v3400_v4  ;;  %1525 = vmatpush.bf16.msrb.mxu3 %v2662_v23 }
  0x42   : > { %2573 = vmatmul.msk.bf16.gmra.mxu3 %vm424_vm0, %v3400_v4 }
  0x43   : > { %1572 = vmatpush.bf16.msra.mxu0 %v2742_v40 }
  0x4d   : > { %2550 = vmatmul.msk.bf16.gmra.mxu0 %vm424_vm0, %v3424_v13 }
  0x4e   : > { %2558 = vmatmul.msk.bf16.gmra.mxu1 %vm424_vm0, %v3424_v13 }
  0x50   : > { %2566 = vmatmul.msk.bf16.gmra.mxu2 %vm424_vm0, %v3424_v13 }
  0x52   : > { %2574 = vmatmul.msk.bf16.gmra.mxu3 %vm424_vm0, %v3424_v13 }
  0x5d   : > { %2551 = vmatmul.msk.bf16.gmra.mxu0 %vm424_vm0, %v3436_v16 }
  0x5e   : > { %2559 = vmatmul.msk.bf16.gmra.mxu1 %vm424_vm0, %v3436_v16 }
  0x60   : > { %2567 = vmatmul.msk.bf16.gmra.mxu2 %vm424_vm0, %v3436_v16 }
  0x62   : > { %2575 = vmatmul.msk.bf16.gmra.mxu3 %vm424_vm0, %v3436_v16 }
  0x6d   : > { %2552 = vmatmul.msk.bf16.gmra.mxu0 %vm424_vm0, %v3484_v37 }
  0x6e   : > { %2560 = vmatmul.msk.bf16.gmra.mxu1 %vm424_vm0, %v3484_v37 }
  0x70   : > { %2568 = vmatmul.msk.bf16.gmra.mxu2 %vm424_vm0, %v3484_v37 }
  0x72   : > { %2576 = vmatmul.msk.bf16.gmra.mxu3 %vm424_vm0, %v3484_v37 }
  0x7d   : > { %2553 = vmatmul.msk.bf16.gmra.mxu0 %vm424_vm0, %v3532_v59 }
  0x7e   : > { %2561 = vmatmul.msk.bf16.gmra.mxu1 %vm424_vm0, %v3532_v59 }
  0x80   : > { %2569 = vmatmul.msk.bf16.gmra.mxu2 %vm424_vm0, %v3532_v59 }
  0x82   : > { %2577 = vmatmul.msk.bf16.gmra.mxu3 %vm424_vm0, %v3532_v59 }
  0x8d   : > { %2554 = vmatmul.msk.bf16.gmra.mxu0 %vm424_vm0, %v3592_v26 }
  0x8e   : > { %2562 = vmatmul.msk.bf16.gmra.mxu1 %vm424_vm0, %v3592_v26 }
  0x90   : > { %2570 = vmatmul.msk.bf16.gmra.mxu2 %vm424_vm0, %v3592_v26 }
  0x92   : > { %2578 = vmatmul.msk.bf16.gmra.mxu3 %vm424_vm0, %v3592_v26 }
  0x9a   : > { %v458_v33 = vpop.f32.mrf.mxu0 }
  0x9b   : > { %v507_v34 = vpop.f32.mrf.mxu1  ;;  %v743_v42 = vmax.f32 %v458_v33, 0.0 }
  0x9c   : > { %v744_v45 = vmax.f32 %v507_v34, 0.0 }
  0x9d   : > { %2579 = vmatmul.msk.bf16.vlgmr.msrb.gmra.mxu0 %vm424_vm0, %v3364_v55 }
  0x9e   : > { %2587 = vmatmul.msk.bf16.vlgmr.msrb.gmra.mxu1 %vm424_vm0, %v3364_v55 }
  0xa2   : > { %v460_v55 = vpop.f32.mrf.mxu0 }
  0xa3   : > { %v749_v43 = vmax.f32 %v460_v55, 0.0  ;;  %v509_v44 = vpop.f32.mrf.mxu1  ;;  %v3630_v47 = vpop.f32.mrf.mxu2 }
  0xa4   : > { %v750_v46 = vmax.f32 %v509_v44, 0.0 }
  0xa5   : > { %v3632_v48 = vpack.c.bf16 %v749_v43, %v743_v42  ;;  %v3636_v50 = vpop.f32.mrf.mxu3 }
  0xa6   : > { %v3634_v49 = vpack.c.bf16 %v750_v46, %v744_v45 }
  0xa7   : > { %1477 = vmatmul.bf16.vlgmr.msrb.gmra.mxu2 %v3632_v48 }
  0xa8   : > { %1526 = vmatmul.bf16.vlgmr.msrb.gmra.mxu3 %v3634_v49 }
  0xaa   : > { %v463_v51 = vpop.f32.mrf.mxu0 }
  0xab   : > { %v512_v52 = vpop.f32.mrf.mxu1  ;;  %v3640_v53 = vpop.f32.mrf.mxu2  ;;  %v755_v63 = vmax.f32 %v463_v51, 0.0 }
  0xac   : > { %v756_v3 = vmax.f32 %v512_v52, 0.0 }
  0xad   : > { %2580 = vmatmul.msk.bf16.gmra.mxu0 %vm424_vm0, %v3388_v1  ;;  %v3646_v54 = vpop.f32.mrf.mxu3 }
  0xae   : > { %2588 = vmatmul.msk.bf16.gmra.mxu1 %vm424_vm0, %v3388_v1  ;;  %v2822_v1 = vor.u32 %v3126_v61, %v2821_v58 }
  0xb0   : > { %1619 = vmatpush.bf16.msra.mxu1 %v2822_v1 }
  0xb2   : > { %v465_v62 = vpop.f32.mrf.mxu0 }
  0xb3   : > { %v761_v0 = vmax.f32 %v465_v62, 0.0  ;;  %v514_v2 = vpop.f32.mrf.mxu1  ;;  %v3660_v6 = vpop.f32.mrf.mxu2  ;;  %v2733_v62 = vld [vmem:[%s4699_s2 + $0x110] sm:$0xf] }
  0xb4   : > { %v762_v5 = vmax.f32 %v514_v2, 0.0 }
  0xb5   : > { %v3662_v7 = vpack.c.bf16 %v761_v0, %v755_v63  ;;  %v3666_v9 = vpop.f32.mrf.mxu3  ;;  %v3104_v63 = vld [vmem:[%s4699_s2 + $0x114] sm:$0xf0]  ;;  %v2797_v0 = vld [vmem:[%s4699_s2 + $0x190] sm:$0xf] }
  0xb6   : > { %v3664_v8 = vpack.c.bf16 %v762_v5, %v756_v3  ;;  %v2734_v2 = vor.u32 %v3104_v63, %v2733_v62  ;;  %v3120_v3 = vld [vmem:[%s4699_s2 + $0x194] sm:$0xf0] }
  0xb7   : > { %1482 = vmatmul.bf16.gmra.mxu2 %v3662_v7  ;;  %v3144_v63 = vld [vmem:[%s4699_s2 + $0x254] sm:$0xf0] }
  0xb8   : > { %1531 = vmatmul.bf16.gmra.mxu3 %v3664_v8  ;;  %1573 = vmatpush.bf16.msra.mxu0 %v2734_v2  ;;  %v3160_v2 = vld [vmem:[%s4699_s2 + $0x2d4] sm:$0xf0] }
  0xba   : > { %v468_v10 = vpop.f32.mrf.mxu0 }
  0xbb   : > { %v517_v11 = vpop.f32.mrf.mxu1  ;;  %v3670_v12 = vpop.f32.mrf.mxu2  ;;  %v767_v22 = vmax.f32 %v468_v10, 0.0 }
  0xbc   : > { %v768_v25 = vmax.f32 %v517_v11, 0.0 }
  0xbd   : > { %2581 = vmatmul.msk.bf16.gmra.mxu0 %vm424_vm0, %v3400_v4  ;;  %v3676_v14 = vpop.f32.mrf.mxu3 }
  0xbe   : > { %2589 = vmatmul.msk.bf16.gmra.mxu1 %vm424_vm0, %v3400_v4  ;;  %v2814_v4 = vor.u32 %v3124_v20, %v2813_v18 }
  0xc0   : > { %1620 = vmatpush.bf16.msra.mxu1 %v2814_v4 }
  0xc2   : > { %v470_v21 = vpop.f32.mrf.mxu0 }
  0xc3   : > { %v773_v23 = vmax.f32 %v470_v21, 0.0  ;;  %v519_v24 = vpop.f32.mrf.mxu1  ;;  %v3690_v28 = vpop.f32.mrf.mxu2 }
  0xc4   : > { %v774_v27 = vmax.f32 %v519_v24, 0.0  ;;  %v2973_v24 = vld [vmem:[%s4699_s2 + $0x2f0] sm:$0xf] }
  0xc5   : > { %v3692_v29 = vpack.c.bf16 %v773_v23, %v767_v22  ;;  %v3696_v31 = vpop.f32.mrf.mxu3  ;;  %v2909_v22 = vld [vmem:[%s4699_s2 + $0x270] sm:$0xf]  ;;  %v3148_v23 = vld [vmem:[%s4699_s2 + $0x274] sm:$0xf0] }
  0xc6   : > { %v3694_v30 = vpack.c.bf16 %v774_v27, %v768_v25  ;;  %v2910_v25 = vor.u32 %v3148_v23, %v2909_v22  ;;  %v3164_v27 = vld [vmem:[%s4699_s2 + $0x2f4] sm:$0xf0]  ;;  %v3158_v23 = vld [vmem:[%s4699_s2 + $0x2c4] sm:$0xf0] }
  0xc7   : > { %1487 = vmatmul.bf16.gmra.mxu2 %v3692_v29 }
  0xc8   : > { %1536 = vmatmul.bf16.gmra.mxu3 %v3694_v30  ;;  %1665 = vmatpush.bf16.msra.mxu2 %v2910_v25 }
  0xca   : > { %v473_v32 = vpop.f32.mrf.mxu0 }
  0xcb   : > { %v522_v33 = vpop.f32.mrf.mxu1  ;;  %v3700_v34 = vpop.f32.mrf.mxu2  ;;  %v779_v42 = vmax.f32 %v473_v32, 0.0  ;;  %v2974_v32 = vor.u32 %v3164_v27, %v2973_v24 }
  0xcc   : > { %v780_v45 = vmax.f32 %v522_v33, 0.0 }
  0xcd   : > { %2582 = vmatmul.msk.bf16.gmra.mxu0 %vm424_vm0, %v3424_v13  ;;  %v3706_v35 = vpop.f32.mrf.mxu3  ;;  %1714 = vmatpush.bf16.msra.mxu3 %v2974_v32 }
  0xce   : > { %2590 = vmatmul.msk.bf16.gmra.mxu1 %vm424_vm0, %v3424_v13  ;;  %v2806_v13 = vor.u32 %v3122_v41, %v2805_v39  ;;  %v2965_v39 = vld [vmem:[%s4699_s2 + $0x2e0] sm:$0xf]  ;;  %v2902_v41 = vor.u32 %v3146_v38, %v2901_v36 }
  0xd0   : > { %1621 = vmatpush.bf16.msra.mxu1 %v2806_v13  ;;  %v3162_v13 = vld [vmem:[%s4699_s2 + $0x2e4] sm:$0xf0]  ;;  %1666 = vmatpush.bf16.msra.mxu2 %v2902_v41 }
  0xd2   : > { %v475_v55 = vpop.f32.mrf.mxu0 }
  0xd3   : > { %v785_v43 = vmax.f32 %v475_v55, 0.0  ;;  %v524_v44 = vpop.f32.mrf.mxu1  ;;  %v3720_v51 = vpop.f32.mrf.mxu2 }
  0xd4   : > { %v786_v46 = vmax.f32 %v524_v44, 0.0  ;;  %v2725_v44 = vld [vmem:[%s4699_s2 + $0x100] sm:$0xf] }
  0xd5   : > { %v3722_v52 = vpack.c.bf16 %v785_v43, %v779_v42  ;;  %v3726_v57 = vpop.f32.mrf.mxu3  ;;  %v2966_v42 = vor.u32 %v3162_v13, %v2965_v39  ;;  %v3140_v13 = vld [vmem:[%s4699_s2 + $0x234] sm:$0xf0] }
  0xd6   : > { %v3724_v56 = vpack.c.bf16 %v786_v46, %v780_v45  ;;  %v3102_v45 = vld [vmem:[%s4699_s2 + $0x104] sm:$0xf0]  ;;  %v2789_v46 = vld [vmem:[%s4699_s2 + $0x180] sm:$0xf] }
  0xd7   : > { %1492 = vmatmul.bf16.gmra.mxu2 %v3722_v52  ;;  %1715 = vmatpush.bf16.msra.mxu3 %v2966_v42  ;;  %v3156_v42 = vld [vmem:[%s4699_s2 + $0x2b4] sm:$0xf0] }
  0xd8   : > { %1541 = vmatmul.bf16.gmra.mxu3 %v3724_v56 }
  0xda   : > { %v478_v58 = vpop.f32.mrf.mxu0 }
  0xdb   : > { %v527_v60 = vpop.f32.mrf.mxu1  ;;  %v3730_v61 = vpop.f32.mrf.mxu2  ;;  %v791_v10 = vmax.f32 %v478_v58, 0.0  ;;  %v2726_v58 = vor.u32 %v3102_v45, %v2725_v44 }
  0xdc   : > { %v792_v17 = vmax.f32 %v527_v60, 0.0  ;;  %v2893_v60 = vld [vmem:[%s4699_s2 + $0x250] sm:$0xf] }
  0xdd   : > { %2583 = vmatmul.msk.bf16.gmra.mxu0 %vm424_vm0, %v3436_v16  ;;  %v3736_v1 = vpop.f32.mrf.mxu3 }
  0xde   : > { %2591 = vmatmul.msk.bf16.gmra.mxu1 %vm424_vm0, %v3436_v16  ;;  %v2798_v16 = vor.u32 %v3120_v3, %v2797_v0  ;;  %v2957_v0 = vld [vmem:[%s4699_s2 + $0x2d0] sm:$0xf]  ;;  %1574 = vmatpush.bf16.msra.mxu0 %v2726_v58  ;;  %v2894_v3 = vor.u32 %v3144_v63, %v2893_v60  ;;  %v2869_v58 = vld [vmem:[%s4699_s2 + $0x220] sm:$0xf]  ;;  %v3154_v63 = vld [vmem:[%s4699_s2 + $0x2a4] sm:$0xf0] }
  0xdf   : > { %v2933_v60 = vld [vmem:[%s4699_s2 + $0x2a0] sm:$0xf] }
  0xe0   : > { %1622 = vmatpush.bf16.msra.mxu1 %v2798_v16  ;;  %v2958_v16 = vor.u32 %v3160_v2, %v2957_v0  ;;  %1667 = vmatpush.bf16.msra.mxu2 %v2894_v3  ;;  %v2934_v3 = vor.u32 %v3154_v63, %v2933_v60 }
  0xe2   : > { %v480_v5 = vpop.f32.mrf.mxu0  ;;  %1716 = vmatpush.bf16.msra.mxu3 %v2958_v16 }
  0xe3   : > { %v797_v11 = vmax.f32 %v480_v5, 0.0  ;;  %v529_v15 = vpop.f32.mrf.mxu1  ;;  %v3750_v19 = vpop.f32.mrf.mxu2 }
  0xe4   : > { %v798_v18 = vmax.f32 %v529_v15, 0.0  ;;  %v2949_v15 = vld [vmem:[%s4699_s2 + $0x2c0] sm:$0xf] }
  0xe5   : > { %v3752_v20 = vpack.c.bf16 %v797_v11, %v791_v10  ;;  %v3756_v21 = vpop.f32.mrf.mxu3  ;;  %v2885_v10 = vld [vmem:[%s4699_s2 + $0x240] sm:$0xf]  ;;  %v3142_v11 = vld [vmem:[%s4699_s2 + $0x244] sm:$0xf0]  ;;  %v2950_v36 = vor.u32 %v3158_v23, %v2949_v15  ;;  %v2925_v23 = vld [vmem:[%s4699_s2 + $0x290] sm:$0xf] }
  0xe6   : > { %v3754_v4 = vpack.c.bf16 %v798_v18, %v792_v17  ;;  %v2886_v32 = vor.u32 %v3142_v11, %v2885_v10  ;;  %v2655_v10 = vld [vmem:[%s4699_s2 + $0x78] sm:$0xf0]  ;;  %v3099_v11 = vld [vmem:[%s4699_s2 + $0xf4] sm:$0xf] }
  0xe7   : > { %1497 = vmatmul.bf16.gmra.mxu2 %v3752_v20  ;;  %1717 = vmatpush.bf16.msra.mxu3 %v2950_v36 }
  0xe8   : > { %1546 = vmatmul.bf16.gmra.mxu3 %v3754_v4  ;;  %1668 = vmatpush.bf16.msra.mxu2 %v2886_v32 }
  0xea   : > { %v483_v33 = vpop.f32.mrf.mxu0 }
  0xeb   : > { %v532_v40 = vpop.f32.mrf.mxu1  ;;  %v3784_v55 = vpop.f32.mrf.mxu2  ;;  %v803_v17 = vmax.f32 %v483_v33, 0.0  ;;  %v2877_v33 = vld [vmem:[%s4699_s2 + $0x230] sm:$0xf] }
  0xec   : > { %v804_v24 = vmax.f32 %v532_v40, 0.0  ;;  %v2941_v40 = vld [vmem:[%s4699_s2 + $0x2b0] sm:$0xf]  ;;  %v2878_v44 = vor.u32 %v3140_v13, %v2877_v33  ;;  %v2853_v33 = vld [vmem:[%s4699_s2 + $0x200] sm:$0xf] }
  0xed   : > { %2584 = vmatmul.msk.bf16.gmra.mxu0 %vm424_vm0, %v3484_v37  ;;  %v3790_v43 = vpop.f32.mrf.mxu3  ;;  %v2942_v45 = vor.u32 %v3156_v42, %v2941_v40  ;;  %v3134_v13 = vld [vmem:[%s4699_s2 + $0x204] sm:$0xf0]  ;;  %v2917_v40 = vld [vmem:[%s4699_s2 + $0x280] sm:$0xf] }
  0xee   : > { %2592 = vmatmul.msk.bf16.gmra.mxu1 %vm424_vm0, %v3484_v37  ;;  %v3118_v37 = vld [vmem:[%s4699_s2 + $0x184] sm:$0xf0]  ;;  %1669 = vmatpush.bf16.msra.mxu2 %v2878_v44 }
  0xef   : > { %v2790_v62 = vor.u32 %v3118_v37, %v2789_v46  ;;  %v3138_v37 = vld [vmem:[%s4699_s2 + $0x224] sm:$0xf0]  ;;  %1718 = vmatpush.bf16.msra.mxu3 %v2942_v45 }
  0xf0   : > { %v2870_v2 = vor.u32 %v3138_v37, %v2869_v58  ;;  %v3150_v58 = vld [vmem:[%s4699_s2 + $0x284] sm:$0xf0] }
  0xf1   : > { %1623 = vmatpush.bf16.msra.mxu1 %v2790_v62 }
  0xf2   : > { %v485_v5 = vpop.f32.mrf.mxu0  ;;  %1670 = vmatpush.bf16.msra.mxu2 %v2870_v2  ;;  %v2854_v2 = vor.u32 %v3134_v13, %v2853_v33 }
  0xf3   : > { %v809_v18 = vmax.f32 %v485_v5, 0.0  ;;  %v534_v22 = vpop.f32.mrf.mxu1  ;;  %v3828_v27 = vpop.f32.mrf.mxu2  ;;  %v3083_v5 = vld [vmem:[%s4699_s2 + $0x74] sm:$0xf]  ;;  %1719 = vmatpush.bf16.msra.mxu3 %v2934_v3  ;;  %v2918_v3 = vor.u32 %v3150_v58, %v2917_v40  ;;  %v745_v58 = vmax.f32 %v3630_v47, 0.0 }
  0xf4   : > { %v810_v25 = vmax.f32 %v534_v22, 0.0  ;;  %v2658_v15 = vor.u32 %v3083_v5, %v2655_v10  ;;  %v3136_v22 = vld [vmem:[%s4699_s2 + $0x214] sm:$0xf0]  ;;  %v3079_v47 = vld [vmem:[%s4699_s2 + $0x54] sm:$0xf] }
  0xf5   : > { %v3830_v38 = vpack.c.bf16 %v809_v18, %v803_v17  ;;  %v3834_v41 = vpop.f32.mrf.mxu3  ;;  %v2861_v17 = vld [vmem:[%s4699_s2 + $0x210] sm:$0xf] }
  0xf6   : > { %v3832_v39 = vpack.c.bf16 %v810_v25, %v804_v24  ;;  %v3152_v24 = vld [vmem:[%s4699_s2 + $0x294] sm:$0xf0]  ;;  %1763 = vmatpush.bf16.msrb.mxu0 %v2658_v15  ;;  %v2862_v25 = vor.u32 %v3136_v22, %v2861_v17  ;;  %v3081_v17 = vld [vmem:[%s4699_s2 + $0x64] sm:$0xf] }
  0xf7   : > { %1502 = vmatmul.bf16.gmra.mxu2 %v3830_v38  ;;  %v2926_v32 = vor.u32 %v3152_v24, %v2925_v23  ;;  %v3097_v22 = vld [vmem:[%s4699_s2 + $0xe4] sm:$0xf]  ;;  %v2711_v24 = vld [vmem:[%s4699_s2 + $0xe8] sm:$0xf0] }
  0xf8   : > { %1551 = vmatmul.bf16.gmra.mxu3 %v3832_v39  ;;  %1671 = vmatpush.bf16.msra.mxu2 %v2862_v25 }
  0xf9   : > { %1720 = vmatpush.bf16.msra.mxu3 %v2926_v32 }
  0xfa   : > { %v488_v46 = vpop.f32.mrf.mxu0 }
  0xfb   : > { %v537_v62 = vpop.f32.mrf.mxu1  ;;  %v3862_v0 = vpop.f32.mrf.mxu2  ;;  %v815_v42 = vmax.f32 %v488_v46, 0.0 }
  0xfc   : > { %v816_v37 = vmax.f32 %v537_v62, 0.0  ;;  %1672 = vmatpush.bf16.msra.mxu2 %v2854_v2  ;;  %v746_v2 = vmax.f32 %v3636_v50, 0.0  ;;  %v2639_v50 = vld [vmem:[%s4699_s2 + $0x58] sm:$0xf0] }
  0xfd   : > { %2585 = vmatmul.msk.bf16.gmra.mxu0 %vm424_vm0, %v3532_v59  ;;  %v3868_v16 = vpop.f32.mrf.mxu3  ;;  %1721 = vmatpush.bf16.msra.mxu3 %v2918_v3  ;;  %v752_v3 = vmax.f32 %v3646_v54, 0.0  ;;  %v2642_v54 = vor.u32 %v3079_v47, %v2639_v50  ;;  %v763_v47 = vmax.f32 %v3670_v12, 0.0 }
  0xfe   : > { %2593 = vmatmul.msk.bf16.gmra.mxu1 %vm424_vm0, %v3532_v59  ;;  %v2719_v59 = vld [vmem:[%s4699_s2 + $0xf8] sm:$0xf0] }
  0xff   : > { %v2722_v18 = vor.u32 %v3099_v11, %v2719_v59 }
 0x101   : > { %1812 = vmatpush.bf16.msrb.mxu1 %v2722_v18  ;;  %v2647_v18 = vld [vmem:[%s4699_s2 + $0x68] sm:$0xf0] }
 0x102   : > { %v490_v36 = vpop.f32.mrf.mxu0  ;;  %v2650_v23 = vor.u32 %v3081_v17, %v2647_v18  ;;  %v3952_v18 = vpack.c.bf16 %v752_v3, %v746_v2  ;;  %v757_v3 = vmax.f32 %v3660_v6, 0.0 }
 0x103   : > { %v821_v44 = vmax.f32 %v490_v36, 0.0  ;;  %v539_v45 = vpop.f32.mrf.mxu1  ;;  %v3906_v63 = vpop.f32.mrf.mxu2 }
 0x104   : > { %v822_v60 = vmax.f32 %v539_v45, 0.0  ;;  %1764 = vmatpush.bf16.msrb.mxu0 %v2650_v23 }
 0x105   : > { %v3908_v5 = vpack.c.bf16 %v821_v44, %v815_v42  ;;  %v3912_v11 = vpop.f32.mrf.mxu3 }
 0x106   : > { %v3910_v10 = vpack.c.bf16 %v822_v60, %v816_v37  ;;  %v751_v37 = vmax.f32 %v3640_v53, 0.0  ;;  %v3095_v53 = vld [vmem:[%s4699_s2 + $0xd4] sm:$0xf] }
 0x107   : > { %1507 = vmatmul.bf16.gmra.mxu2 %v3908_v5 }
 0x108   : > { %4719 = vst [vmem:[#allocation2_spill] sm:$0xff] %v3910_v10  ;;  %1556 = vmatmul.bf16.gmra.mxu3 %v3910_v10  ;;  %1765 = vmatpush.bf16.msrb.mxu0 %v2642_v54 }
 0x10a   : > { %v493_v46 = vpop.f32.mrf.mxu0 }
 0x10b   : > { %v542_v62 = vpop.f32.mrf.mxu1  ;;  %v3916_v15 = vpop.f32.mrf.mxu2  ;;  %v827_v32 = vmax.f32 %v493_v46, 0.0 }
 0x10c   : > { %v828_v13 = vmax.f32 %v542_v62, 0.0  ;;  %v3950_v62 = vpack.c.bf16 %v751_v37, %v745_v58  ;;  %v983_v58 = vld [vmem:[%s4700_s3] sm:$0x3] }
 0x10d   : > { %2586 = vmatmul.msk.bf16.gmra.mxu0 %vm424_vm0, %v3592_v26  ;;  %v3922_v59 = vpop.f32.mrf.mxu3  ;;  %v3982_v50 = vperm.slane %v983_v58, 0 }
 0x10e   : > { %2594 = vmatmul.msk.bf16.gmra.mxu1 %vm424_vm0, %v3592_v26  ;;  %v2714_v26 = vor.u32 %v3097_v22, %v2711_v24  ;;  %v2703_v22 = vld [vmem:[%s4699_s2 + $0xd8] sm:$0xf0] }
 0x10f   : > { %v2706_v24 = vor.u32 %v3095_v53, %v2703_v22  ;;  %v3987_v22 = vpack.c.bf16 %v763_v47, %v757_v3 }
 0x110   : > { %1813 = vmatpush.bf16.msrb.mxu1 %v2714_v26 }
 0x112   : > { %v495_v25 = vpop.f32.mrf.mxu0 }
 0x113   : > { %v833_v36 = vmax.f32 %v495_v25, 0.0  ;;  %v544_v33 = vpop.f32.mrf.mxu1  ;;  %v3940_v45 = vpop.f32.mrf.mxu2 }
 0x114   : > { %v834_v40 = vmax.f32 %v544_v33, 0.0  ;;  %1814 = vmatpush.bf16.msrb.mxu1 %v2706_v24 }
 0x115   : > { %v3936_v42 = vpack.c.bf16 %v833_v36, %v827_v32  ;;  %v3945_v60 = vpop.f32.mrf.mxu3 }
 0x116   : > { %v3938_v44 = vpack.c.bf16 %v834_v40, %v828_v13 }
 0x117   : > { %4720 = vst [vmem:[#allocation3_spill] sm:$0xff] %v3936_v42  ;;  %1512 = vmatmul.bf16.gmra.mxu2 %v3936_v42 }
 0x118   : > { %4721 = vst [vmem:[#allocation4_spill] sm:$0xff] %v3938_v44  ;;  %1561 = vmatmul.bf16.gmra.mxu3 %v3938_v44 }
 0x11a   : > { %v654_v46 = vpop.f32.mrf.mxu0 }
 0x11b   : > { %v703_v17 = vpop.f32.mrf.mxu1  ;;  %v3968_v23 = vpop.f32.mrf.mxu2  ;;  %v747_v32 = vmax.f32 %v654_v46, 0.0  ;;  %v758_v46 = vmax.f32 %v3666_v9, 0.0  ;;  %v3077_v9 = vld [vmem:[%s4699_s2 + $0x44] sm:$0xf] }
 0x11c   : > { %v748_v13 = vmax.f32 %v703_v17, 0.0  ;;  %v764_v17 = vmax.f32 %v3676_v14, 0.0  ;;  %v2631_v14 = vld [vmem:[%s4699_s2 + $0x48] sm:$0xf0] }
 0x11d   : > { %1575 = vmatmul.bf16.vlgmr.msra.gmra.mxu0 %v3950_v62  ;;  %v3970_v26 = vpop.f32.mrf.mxu3 }
 0x11e   : > { %1624 = vmatmul.bf16.vlgmr.msra.gmra.mxu1 %v3952_v18 }
 0x122   : > { %v656_v25 = vpop.f32.mrf.mxu0 }
 0x123   : > { %v753_v36 = vmax.f32 %v656_v25, 0.0  ;;  %v705_v33 = vpop.f32.mrf.mxu1 }
 0x124   : > { %v754_v40 = vmax.f32 %v705_v33, 0.0  ;;  %v2634_v33 = vor.u32 %v3077_v9, %v2631_v14 }
 0x125   : > { %v3975_v37 = vpack.c.bf16 %v753_v36, %v747_v32  ;;  %v3990_v32 = vpack.c.bf16 %v764_v17, %v758_v46  ;;  %v3093_v36 = vld [vmem:[%s4699_s2 + $0xc4] sm:$0xf] }
 0x126   : > { %v3977_v2 = vpack.c.bf16 %v754_v40, %v748_v13  ;;  %v2695_v13 = vld [vmem:[%s4699_s2 + $0xc8] sm:$0xf0]  ;;  %1766 = vmatpush.bf16.msrb.mxu0 %v2634_v33  ;;  %v775_v33 = vmax.f32 %v3700_v34, 0.0  ;;  %v2623_v34 = vld [vmem:[%s4699_s2 + $0x38] sm:$0xf0] }
 0x127   : > { %4722 = vst [vmem:[#allocation5_spill] sm:$0xff] %v3975_v37  ;;  %1673 = vmatmul.bf16.vlgmr.msra.gmra.mxu2 %v3975_v37  ;;  %v2698_v40 = vor.u32 %v3093_v36, %v2695_v13  ;;  %v769_v36 = vmax.f32 %v3690_v28, 0.0  ;;  %v776_v13 = vmax.f32 %v3706_v35, 0.0  ;;  %v3091_v35 = vld [vmem:[%s4699_s2 + $0xb4] sm:$0xf] }
 0x128   : > { %4723 = vst [vmem:[#allocation6_spill] sm:$0xff] %v3977_v2  ;;  %1722 = vmatmul.bf16.vlgmr.msra.gmra.mxu3 %v3977_v2 }
 0x129   : > { %1815 = vmatpush.bf16.msrb.mxu1 %v2698_v40 }
 0x12a   : > { %v659_v53 = vpop.f32.mrf.mxu0  ;;  %v1478_v54 = vpop.f32.mrf.mxu2 }
 0x12b   : > { %v708_v24 = vpop.f32.mrf.mxu1  ;;  %v1479_v25 = vadd.f32 %v1478_v54, %v3982_v50  ;;  %v1527_v6 = vpop.f32.mrf.mxu3  ;;  %v759_v47 = vmax.f32 %v659_v53, 0.0  ;;  %v770_v53 = vmax.f32 %v3696_v31, 0.0  ;;  %v3075_v31 = vld [vmem:[%s4699_s2 + $0x34] sm:$0xf] }
 0x12d   : > { %v3992_v12 = vadd.f32 %v1527_v6, %v1479_v25  ;;  %1580 = vmatmul.bf16.gmra.mxu0 %v3987_v22  ;;  %v760_v6 = vmax.f32 %v708_v24, 0.0 }
 0x12e   : > { %1629 = vmatmul.bf16.gmra.mxu1 %v3990_v32 }
 0x132   : > { %v661_v58 = vpop.f32.mrf.mxu0  ;;  %v1480_v3 = vpop.f32.mrf.mxu2 }
 0x133   : > { %v765_v46 = vmax.f32 %v661_v58, 0.0  ;;  %v710_v17 = vpop.f32.mrf.mxu1  ;;  %v1481_v54 = vadd.f32 %v1480_v3, %v3982_v50  ;;  %v1529_v25 = vpop.f32.mrf.mxu3  ;;  %v4021_v58 = vpack.c.bf16 %v775_v33, %v769_v36 }
 0x134   : > { %v766_v2 = vmax.f32 %v710_v17, 0.0  ;;  %v2626_v17 = vor.u32 %v3075_v31, %v2623_v34 }
 0x135   : > { %v4009_v37 = vpack.c.bf16 %v765_v46, %v759_v47  ;;  %v4011_v9 = vadd.f32 %v1529_v25, %v1481_v54  ;;  %v4024_v46 = vpack.c.bf16 %v776_v13, %v770_v53  ;;  %v2687_v54 = vld [vmem:[%s4699_s2 + $0xb8] sm:$0xf0] }
 0x136   : > { %v4013_v14 = vpack.c.bf16 %v766_v2, %v760_v6  ;;  %v2690_v25 = vor.u32 %v3091_v35, %v2687_v54  ;;  %1767 = vmatpush.bf16.msrb.mxu0 %v2626_v17  ;;  %v781_v35 = vmax.f32 %v3720_v51, 0.0  ;;  %v787_v17 = vmax.f32 %v3730_v61, 0.0  ;;  %v2615_v61 = vld [vmem:[%s4699_s2 + $0x28] sm:$0xf0] }
 0x137   : > { %4724 = vst [vmem:[#allocation7_spill] sm:$0xff] %v4009_v37  ;;  %1678 = vmatmul.bf16.gmra.mxu2 %v4009_v37  ;;  %v788_v54 = vmax.f32 %v3736_v1, 0.0  ;;  %v3089_v1 = vld [vmem:[%s4699_s2 + $0xa4] sm:$0xf] }
 0x138   : > { %4725 = vst [vmem:[#allocation8_spill] sm:$0xff] %v4013_v14  ;;  %1727 = vmatmul.bf16.gmra.mxu3 %v4013_v14  ;;  %1816 = vmatpush.bf16.msrb.mxu1 %v2690_v25 }
 0x13a   : > { %v664_v24 = vpop.f32.mrf.mxu0  ;;  %v1483_v40 = vpop.f32.mrf.mxu2 }
 0x13b   : > { %v713_v3 = vpop.f32.mrf.mxu1  ;;  %v1484_v2 = vadd.f32 %v1483_v40, %v3982_v50  ;;  %v1532_v47 = vpop.f32.mrf.mxu3  ;;  %v771_v33 = vmax.f32 %v664_v24, 0.0  ;;  %v782_v24 = vmax.f32 %v3726_v57, 0.0  ;;  %v3073_v57 = vld [vmem:[%s4699_s2 + $0x24] sm:$0xf] }
 0x13d   : > { %v4026_v28 = vadd.f32 %v1532_v47, %v1484_v2  ;;  %1585 = vmatmul.bf16.gmra.mxu0 %v4021_v58  ;;  %v772_v47 = vmax.f32 %v713_v3, 0.0 }
 0x13e   : > { %1634 = vmatmul.bf16.gmra.mxu1 %v4024_v46 }
 0x142   : > { %v666_v6 = vpop.f32.mrf.mxu0  ;;  %v1485_v36 = vpop.f32.mrf.mxu2 }
 0x143   : > { %v777_v53 = vmax.f32 %v666_v6, 0.0  ;;  %v715_v13 = vpop.f32.mrf.mxu1  ;;  %v1486_v40 = vadd.f32 %v1485_v36, %v3982_v50  ;;  %v1534_v2 = vpop.f32.mrf.mxu3  ;;  %v4055_v6 = vpack.c.bf16 %v787_v17, %v781_v35 }
 0x144   : > { %v778_v14 = vmax.f32 %v715_v13, 0.0  ;;  %v2618_v13 = vor.u32 %v3073_v57, %v2615_v61 }
 0x145   : > { %v4043_v37 = vpack.c.bf16 %v777_v53, %v771_v33  ;;  %v4045_v31 = vadd.f32 %v1534_v2, %v1486_v40  ;;  %v4058_v53 = vpack.c.bf16 %v788_v54, %v782_v24  ;;  %v2679_v40 = vld [vmem:[%s4699_s2 + $0xa8] sm:$0xf0] }
 0x146   : > { %v4047_v34 = vpack.c.bf16 %v778_v14, %v772_v47  ;;  %v2682_v2 = vor.u32 %v3089_v1, %v2679_v40  ;;  %1768 = vmatpush.bf16.msrb.mxu0 %v2618_v13  ;;  %v793_v1 = vmax.f32 %v3750_v19, 0.0  ;;  %v799_v13 = vmax.f32 %v3784_v55, 0.0  ;;  %v2607_v55 = vld [vmem:[%s4699_s2 + $0x18] sm:$0xf0] }
 0x147   : > { %4726 = vst [vmem:[#allocation9_spill] sm:$0xff] %v4043_v37  ;;  %1683 = vmatmul.bf16.gmra.mxu2 %v4043_v37  ;;  %v800_v40 = vmax.f32 %v3790_v43, 0.0  ;;  %v3087_v43 = vld [vmem:[%s4699_s2 + $0x94] sm:$0xf] }
 0x148   : > { %4727 = vst [vmem:[#allocation10_spill] sm:$0xff] %v4047_v34  ;;  %1732 = vmatmul.bf16.gmra.mxu3 %v4047_v34  ;;  %1817 = vmatpush.bf16.msrb.mxu1 %v2682_v2 }
 0x14a   : > { %v669_v3 = vpop.f32.mrf.mxu0  ;;  %v1488_v25 = vpop.f32.mrf.mxu2 }
 0x14b   : > { %v718_v36 = vpop.f32.mrf.mxu1  ;;  %v1489_v14 = vadd.f32 %v1488_v25, %v3982_v50  ;;  %v1537_v33 = vpop.f32.mrf.mxu3  ;;  %v783_v17 = vmax.f32 %v669_v3, 0.0  ;;  %v794_v3 = vmax.f32 %v3756_v21, 0.0  ;;  %v3071_v21 = vld [vmem:[%s4699_s2 + $0x14] sm:$0xf] }
 0x14d   : > { %v4060_v51 = vadd.f32 %v1537_v33, %v1489_v14  ;;  %1590 = vmatmul.bf16.gmra.mxu0 %v4055_v6  ;;  %v784_v33 = vmax.f32 %v718_v36, 0.0 }
 0x14e   : > { %1639 = vmatmul.bf16.gmra.mxu1 %v4058_v53 }
 0x152   : > { %v671_v47 = vpop.f32.mrf.mxu0  ;;  %v1490_v35 = vpop.f32.mrf.mxu2 }
 0x153   : > { %v789_v24 = vmax.f32 %v671_v47, 0.0  ;;  %v720_v54 = vpop.f32.mrf.mxu1  ;;  %v1491_v25 = vadd.f32 %v1490_v35, %v3982_v50  ;;  %v1539_v14 = vpop.f32.mrf.mxu3  ;;  %v4089_v47 = vpack.c.bf16 %v799_v13, %v793_v1 }
 0x154   : > { %v790_v34 = vmax.f32 %v720_v54, 0.0  ;;  %v2610_v54 = vor.u32 %v3071_v21, %v2607_v55 }
 0x155   : > { %v4077_v37 = vpack.c.bf16 %v789_v24, %v783_v17  ;;  %v4079_v57 = vadd.f32 %v1539_v14, %v1491_v25  ;;  %v4092_v24 = vpack.c.bf16 %v800_v40, %v794_v3  ;;  %v2671_v25 = vld [vmem:[%s4699_s2 + $0x98] sm:$0xf0] }
 0x156   : > { %v4081_v61 = vpack.c.bf16 %v790_v34, %v784_v33  ;;  %v2674_v14 = vor.u32 %v3087_v43, %v2671_v25  ;;  %1769 = vmatpush.bf16.msrb.mxu0 %v2610_v54  ;;  %v3115_v43 = vld [vmem:[%s4699_s2 + $0x174] sm:$0xf]  ;;  %v811_v25 = vmax.f32 %v3862_v0, 0.0  ;;  %v2775_v0 = vld [vmem:[%s4699_s2 + $0x168] sm:$0xf0] }
 0x157   : > { %4728 = vst [vmem:[#allocation11_spill] sm:$0xff] %v4077_v37  ;;  %1688 = vmatmul.bf16.gmra.mxu2 %v4077_v37  ;;  %v3131_v54 = vld [vmem:[%s4699_s2 + $0x1f4] sm:$0xf] }
 0x158   : > { %4729 = vst [vmem:[#allocation12_spill] sm:$0xff] %v4081_v61  ;;  %1737 = vmatmul.bf16.gmra.mxu3 %v4081_v61  ;;  %1818 = vmatpush.bf16.msrb.mxu1 %v2674_v14  ;;  %v2847_v14 = vld [vmem:[%s4699_s2 + $0x1f8] sm:$0xf0] }
 0x15a   : > { %v674_v36 = vpop.f32.mrf.mxu0  ;;  %v1493_v2 = vpop.f32.mrf.mxu2 }
 0x15b   : > { %v723_v35 = vpop.f32.mrf.mxu1  ;;  %v1494_v34 = vadd.f32 %v1493_v2, %v3982_v50  ;;  %v1542_v17 = vpop.f32.mrf.mxu3  ;;  %v795_v13 = vmax.f32 %v674_v36, 0.0  ;;  %v2783_v36 = vld [vmem:[%s4699_s2 + $0x178] sm:$0xf0] }
 0x15d   : > { %v4094_v19 = vadd.f32 %v1542_v17, %v1494_v34  ;;  %1595 = vmatmul.bf16.gmra.mxu0 %v4089_v47  ;;  %v796_v17 = vmax.f32 %v723_v35, 0.0  ;;  %v805_v35 = vmax.f32 %v3828_v27, 0.0  ;;  %v3113_v27 = vld [vmem:[%s4699_s2 + $0x164] sm:$0xf] }
 0x15e   : > { %1644 = vmatmul.bf16.gmra.mxu1 %v4092_v24 }
 0x162   : > { %v676_v33 = vpop.f32.mrf.mxu0  ;;  %v1495_v1 = vpop.f32.mrf.mxu2 }
 0x163   : > { %v801_v3 = vmax.f32 %v676_v33, 0.0  ;;  %v725_v40 = vpop.f32.mrf.mxu1  ;;  %v1496_v2 = vadd.f32 %v1495_v1, %v3982_v50  ;;  %v1544_v34 = vpop.f32.mrf.mxu3  ;;  %v806_v33 = vmax.f32 %v3834_v41, 0.0  ;;  %v812_v1 = vmax.f32 %v3868_v16, 0.0  ;;  %v3129_v41 = vld [vmem:[%s4699_s2 + $0x1e4] sm:$0xf] }
 0x164   : > { %v802_v61 = vmax.f32 %v725_v40, 0.0  ;;  %v4144_v16 = vpack.c.bf16 %v811_v25, %v805_v35  ;;  %v3069_v35 = vld [vmem:[%s4699_s2 + $0x4] sm:$0xf]  ;;  %v2599_v25 = vld [vmem:[%s4699_s2 + $0x8] sm:$0xf0] }
 0x165   : > { %v4111_v37 = vpack.c.bf16 %v801_v3, %v795_v13  ;;  %v4113_v21 = vadd.f32 %v1544_v34, %v1496_v2  ;;  %v2850_v13 = vor.u32 %v3131_v54, %v2847_v14  ;;  %v4150_v54 = vpack.c.bf16 %v812_v1, %v806_v33  ;;  %v3085_v33 = vld [vmem:[%s4699_s2 + $0x84] sm:$0xf] }
 0x166   : > { %v4115_v55 = vpack.c.bf16 %v802_v61, %v796_v17  ;;  %v2786_v61 = vor.u32 %v3115_v43, %v2783_v36  ;;  %v2778_v43 = vor.u32 %v3113_v27, %v2775_v0  ;;  %v2839_v36 = vld [vmem:[%s4699_s2 + $0x1e8] sm:$0xf0]  ;;  %v2602_v1 = vor.u32 %v3069_v35, %v2599_v25  ;;  %v2767_v27 = vld [vmem:[%s4699_s2 + $0x158] sm:$0xf0]  ;;  %v3109_v35 = vld [vmem:[%s4699_s2 + $0x144] sm:$0xf] }
 0x167   : > { %4730 = vst [vmem:[#allocation13_spill] sm:$0xff] %v4111_v37  ;;  %1693 = vmatmul.bf16.gmra.mxu2 %v4111_v37  ;;  %1910 = vmatpush.bf16.msrb.mxu3 %v2850_v13  ;;  %v2663_v13 = vld [vmem:[%s4699_s2 + $0x88] sm:$0xf0] }
 0x168   : > { %4731 = vst [vmem:[#allocation14_spill] sm:$0xff] %v4115_v55  ;;  %1742 = vmatmul.bf16.gmra.mxu3 %v4115_v55  ;;  %1861 = vmatpush.bf16.msrb.mxu2 %v2786_v61  ;;  %v2842_v61 = vor.u32 %v3129_v41, %v2839_v36  ;;  %v2666_v0 = vor.u32 %v3085_v33, %v2663_v13  ;;  %v2759_v25 = vld [vmem:[%s4699_s2 + $0x148] sm:$0xf0]  ;;  %v3125_v33 = vld [vmem:[%s4699_s2 + $0x1c4] sm:$0xf] }
 0x169   : > { %1770 = vmatpush.bf16.msrb.mxu0 %v2602_v1 }
 0x16a   : > { %v679_v3 = vpop.f32.mrf.mxu0  ;;  %v1498_v40 = vpop.f32.mrf.mxu2  ;;  %1819 = vmatpush.bf16.msrb.mxu1 %v2666_v0  ;;  %v2762_v0 = vor.u32 %v3109_v35, %v2759_v25  ;;  %v2815_v35 = vld [vmem:[%s4699_s2 + $0x1b8] sm:$0xf0]  ;;  %v818_v25 = vmax.f32 %v3912_v11, 0.0  ;;  %v3121_v11 = vld [vmem:[%s4699_s2 + $0x1a4] sm:$0xf] }
 0x16b   : > { %v728_v2 = vpop.f32.mrf.mxu1  ;;  %v1499_v34 = vadd.f32 %v1498_v40, %v3982_v50  ;;  %v1547_v17 = vpop.f32.mrf.mxu3  ;;  %1911 = vmatpush.bf16.msrb.mxu3 %v2842_v61  ;;  %v3111_v40 = vld [vmem:[%s4699_s2 + $0x154] sm:$0xf]  ;;  %v807_v13 = vmax.f32 %v679_v3, 0.0 }
 0x16c   : > { %1862 = vmatpush.bf16.msrb.mxu2 %v2778_v43  ;;  %v2770_v41 = vor.u32 %v3111_v40, %v2767_v27  ;;  %v3107_v3 = vld [vmem:[%s4699_s2 + $0x134] sm:$0xf] }
 0x16d   : > { %v4152_v14 = vadd.f32 %v1547_v17, %v1499_v34  ;;  %1600 = vmatmul.bf16.gmra.mxu0 %v4144_v16  ;;  %v3127_v34 = vld [vmem:[%s4699_s2 + $0x1d4] sm:$0xf]  ;;  %v2831_v17 = vld [vmem:[%s4699_s2 + $0x1d8] sm:$0xf0] }
 0x16e   : > { %1649 = vmatmul.bf16.gmra.mxu1 %v4150_v54  ;;  %v2834_v43 = vor.u32 %v3127_v34, %v2831_v17  ;;  %v808_v17 = vmax.f32 %v728_v2, 0.0  ;;  %v3123_v2 = vld [vmem:[%s4699_s2 + $0x1b4] sm:$0xf] }
 0x170   : > { %1863 = vmatpush.bf16.msrb.mxu2 %v2770_v41  ;;  %1912 = vmatpush.bf16.msrb.mxu3 %v2834_v43  ;;  %v2823_v41 = vld [vmem:[%s4699_s2 + $0x1c8] sm:$0xf0]  ;;  %v2751_v43 = vld [vmem:[%s4699_s2 + $0x138] sm:$0xf0] }
 0x171   : > { %v2826_v37 = vor.u32 %v3125_v33, %v2823_v41  ;;  %v824_v33 = vmax.f32 %v3922_v59, 0.0  ;;  %v2807_v41 = vld [vmem:[%s4699_s2 + $0x1a8] sm:$0xf0] }
 0x172   : > { %v681_v36 = vpop.f32.mrf.mxu0  ;;  %v1500_v61 = vpop.f32.mrf.mxu2 }
 0x173   : > { %v813_v40 = vmax.f32 %v681_v36, 0.0  ;;  %v730_v1 = vpop.f32.mrf.mxu1  ;;  %v1501_v27 = vadd.f32 %v1500_v61, %v3982_v50  ;;  %v1549_v34 = vpop.f32.mrf.mxu3  ;;  %v817_v36 = vmax.f32 %v3906_v63, 0.0  ;;  %v823_v61 = vmax.f32 %v3916_v15, 0.0  ;;  %v3105_v63 = vld [vmem:[%s4699_s2 + $0x124] sm:$0xf] }
 0x174   : > { %v814_v55 = vmax.f32 %v730_v1, 0.0  ;;  %1864 = vmatpush.bf16.msrb.mxu2 %v2762_v0  ;;  %1913 = vmatpush.bf16.msrb.mxu3 %v2826_v37  ;;  %v2743_v15 = vld [vmem:[%s4699_s2 + $0x128] sm:$0xf0] }
 0x175   : > { %v4193_v44 = vpack.c.bf16 %v813_v40, %v807_v13  ;;  %v4195_v42 = vadd.f32 %v1549_v34, %v1501_v27  ;;  %v2818_v13 = vor.u32 %v3123_v2, %v2815_v35  ;;  %v4226_v37 = vpack.c.bf16 %v823_v61, %v817_v36  ;;  %v3147_v2 = vld [vmem:[%s4699_s2 + $0x274] sm:$0xf]  ;;  %v2911_v36 = vld [vmem:[%s4699_s2 + $0x278] sm:$0xf0] }
 0x176   : > { %v4197_v10 = vpack.c.bf16 %v814_v55, %v808_v17  ;;  %v2754_v55 = vor.u32 %v3107_v3, %v2751_v43  ;;  %v2746_v0 = vor.u32 %v3105_v63, %v2743_v15  ;;  %v4232_v17 = vpack.c.bf16 %v824_v33, %v818_v25  ;;  %v3163_v61 = vld [vmem:[%s4699_s2 + $0x2f4] sm:$0xf]  ;;  %v2975_v35 = vld [vmem:[%s4699_s2 + $0x2f8] sm:$0xf0] }
 0x177   : > { %4732 = vst [vmem:[#allocation15_spill] sm:$0xff] %v4193_v44  ;;  %1698 = vmatmul.bf16.gmra.mxu2 %v4193_v44  ;;  %v2810_v3 = vor.u32 %v3121_v11, %v2807_v41  ;;  %v3103_v25 = vld [vmem:[%s4699_s2 + $0x114] sm:$0xf]  ;;  %v2735_v33 = vld [vmem:[%s4699_s2 + $0x118] sm:$0xf0] }
 0x178   : > { %4733 = vst [vmem:[#allocation16_spill] sm:$0xff] %v4197_v10  ;;  %1747 = vmatmul.bf16.gmra.mxu3 %v4197_v10  ;;  %1865 = vmatpush.bf16.msrb.mxu2 %v2754_v55  ;;  %v2914_v55 = vor.u32 %v3147_v2, %v2911_v36  ;;  %v3119_v63 = vld [vmem:[%s4699_s2 + $0x194] sm:$0xf]  ;;  %v2799_v15 = vld [vmem:[%s4699_s2 + $0x198] sm:$0xf0] }
 0x179   : > { %1914 = vmatpush.bf16.msrb.mxu3 %v2818_v13  ;;  %v2978_v13 = vor.u32 %v3163_v61, %v2975_v35  ;;  %v2802_v11 = vor.u32 %v3119_v63, %v2799_v15  ;;  %v2727_v41 = vld [vmem:[%s4699_s2 + $0x108] sm:$0xf0] }
 0x17a   : > { %v684_v40 = vpop.f32.mrf.mxu0  ;;  %v1503_v1 = vpop.f32.mrf.mxu2  ;;  %1959 = vmatpush.bf16.msra.mxu0 %v2914_v55 }
 0x17b   : > { %v733_v59 = vpop.f32.mrf.mxu1  ;;  %v1504_v27 = vadd.f32 %v1503_v1, %v3982_v50  ;;  %v1552_v34 = vpop.f32.mrf.mxu3  ;;  %v2738_v1 = vor.u32 %v3103_v25, %v2735_v33  ;;  %2008 = vmatpush.bf16.msra.mxu1 %v2978_v13  ;;  %v819_v2 = vmax.f32 %v684_v40, 0.0  ;;  %v2791_v33 = vld [vmem:[%s4699_s2 + $0x188] sm:$0xf0]  ;;  %v829_v40 = vmax.f32 %v3940_v45, 0.0 }
 0x17c   : > { %1866 = vmatpush.bf16.msrb.mxu2 %v2746_v0  ;;  %v3101_v0 = vld [vmem:[%s4699_s2 + $0x104] sm:$0xf]  ;;  %v820_v13 = vmax.f32 %v733_v59, 0.0  ;;  %v836_v59 = vmax.f32 %v3970_v26, 0.0  ;;  %v2903_v26 = vld [vmem:[%s4699_s2 + $0x268] sm:$0xf0] }
 0x17d   : > { %v4234_v43 = vadd.f32 %v1552_v34, %v1504_v27  ;;  %1605 = vmatmul.bf16.gmra.mxu0 %v4226_v37  ;;  %1915 = vmatpush.bf16.msrb.mxu3 %v2810_v3  ;;  %v3117_v3 = vld [vmem:[%s4699_s2 + $0x184] sm:$0xf]  ;;  %v2730_v25 = vor.u32 %v3101_v0, %v2727_v41 }
 0x17e   : > { %1654 = vmatmul.bf16.gmra.mxu1 %v4232_v17  ;;  %v2794_v63 = vor.u32 %v3117_v3, %v2791_v33 }
 0x180   : > { %1867 = vmatpush.bf16.msrb.mxu2 %v2738_v1 }
 0x181   : > { %1916 = vmatpush.bf16.msrb.mxu3 %v2802_v11  ;;  %v830_v11 = vmax.f32 %v3945_v60, 0.0  ;;  %v3145_v60 = vld [vmem:[%s4699_s2 + $0x264] sm:$0xf] }
 0x182   : > { %v686_v27 = vpop.f32.mrf.mxu0  ;;  %v1505_v34 = vpop.f32.mrf.mxu2 }
 0x183   : > { %v825_v36 = vmax.f32 %v686_v27, 0.0  ;;  %v735_v61 = vpop.f32.mrf.mxu1  ;;  %v1506_v55 = vadd.f32 %v1505_v34, %v3982_v50  ;;  %v1554_v35 = vpop.f32.mrf.mxu3  ;;  %v835_v27 = vmax.f32 %v3968_v23, 0.0  ;;  %v4290_v45 = vpack.c.bf16 %v836_v59, %v830_v11 }
 0x184   : > { %v826_v1 = vmax.f32 %v735_v61, 0.0  ;;  %1868 = vmatpush.bf16.msrb.mxu2 %v2730_v25  ;;  %v3161_v61 = vld [vmem:[%s4699_s2 + $0x2e4] sm:$0xf] }
 0x185   : > { %v4275_v15 = vpack.c.bf16 %v825_v36, %v819_v2  ;;  %v4277_v10 = vadd.f32 %v1554_v35, %v1506_v55  ;;  %1917 = vmatpush.bf16.msrb.mxu3 %v2794_v63  ;;  %v4287_v41 = vpack.c.bf16 %v835_v27, %v829_v40  ;;  %v2906_v55 = vor.u32 %v3145_v60, %v2903_v26  ;;  %v2967_v35 = vld [vmem:[%s4699_s2 + $0x2e8] sm:$0xf0] }
 0x186   : > { %v4279_v44 = vpack.c.bf16 %v826_v1, %v820_v13  ;;  %v2970_v25 = vor.u32 %v3161_v61, %v2967_v35 }
 0x187   : > { %1703 = vmatmul.bf16.gmra.mxu2 %v4275_v15  ;;  %1960 = vmatpush.bf16.msra.mxu0 %v2906_v55 }
 0x188   : > { %1752 = vmatmul.bf16.gmra.mxu3 %v4279_v44  ;;  %2009 = vmatpush.bf16.msra.mxu1 %v2970_v25 }
 0x18a   : > { %v689_v34 = vpop.f32.mrf.mxu0  ;;  %v1508_v0 = vpop.f32.mrf.mxu2 }
 0x18b   : > { %v738_v3 = vpop.f32.mrf.mxu1  ;;  %v1509_v2 = vadd.f32 %v1508_v0, %v3982_v50  ;;  %v1557_v36 = vpop.f32.mrf.mxu3  ;;  %v831_v1 = vmax.f32 %v689_v34, 0.0 }
 0x18c   : > { %v832_v59 = vmax.f32 %v738_v3, 0.0 }
 0x18d   : > { %v4292_v23 = vadd.f32 %v1557_v36, %v1509_v2  ;;  %1610 = vmatmul.bf16.gmra.mxu0 %v4287_v41 }
 0x18e   : > { %1659 = vmatmul.bf16.gmra.mxu1 %v4290_v45 }
 0x192   : > { %v691_v33 = vpop.f32.mrf.mxu0  ;;  %v1510_v13 = vpop.f32.mrf.mxu2 }
 0x193   : > { %v837_v63 = vmax.f32 %v691_v33, 0.0  ;;  %v740_v40 = vpop.f32.mrf.mxu1  ;;  %v1511_v27 = vadd.f32 %v1510_v13, %v3982_v50  ;;  %v1559_v11 = vpop.f32.mrf.mxu3  ;;  %v3143_v13 = vld [vmem:[%s4699_s2 + $0x254] sm:$0xf] }
 0x194   : > { %v838_v0 = vmax.f32 %v740_v40, 0.0  ;;  %v2959_v40 = vld [vmem:[%s4699_s2 + $0x2d8] sm:$0xf0] }
 0x195   : > { %v4309_v2 = vpack.c.bf16 %v837_v63, %v831_v1  ;;  %v4311_v36 = vadd.f32 %v1559_v11, %v1511_v27  ;;  %v2895_v1 = vld [vmem:[%s4699_s2 + $0x258] sm:$0xf0] }
 0x196   : > { %v4313_v60 = vpack.c.bf16 %v838_v0, %v832_v59  ;;  %v2898_v63 = vor.u32 %v3143_v13, %v2895_v1 }
 0x197   : > { %1708 = vmatmul.bf16.gmra.mxu2 %v4309_v2 }
 0x198   : > { %1757 = vmatmul.bf16.gmra.mxu3 %v4313_v60  ;;  %1961 = vmatpush.bf16.msra.mxu0 %v2898_v63 }
 0x19a   : > { %v1513_v26 = vpop.f32.mrf.mxu2  ;;  %v1576_v34 = vpop.f32.mrf.mxu0 }
 0x19b   : > { %v1514_v61 = vadd.f32 %v1513_v26, %v3982_v50  ;;  %v1562_v55 = vpop.f32.mrf.mxu3  ;;  %v1577_v35 = vadd.f32 %v1576_v34, %v3992_v12  ;;  %v1625_v25 = vpop.f32.mrf.mxu1  ;;  %v3159_v12 = vld [vmem:[%s4699_s2 + $0x2d4] sm:$0xf] }
 0x19d   : > { %v4319_v3 = vadd.f32 %v1562_v55, %v1514_v61  ;;  %v1626_v33 = vadd.f32 %v1625_v25, %v1577_v35  ;;  %1771 = vmatmul.bf16.vlgmr.msrb.gmra.mxu0 %v3632_v48  ;;  %v2962_v48 = vor.u32 %v3159_v12, %v2959_v40 }
 0x19e   : > { %1820 = vmatmul.bf16.vlgmr.msrb.gmra.mxu1 %v3634_v49 }
 0x19f   : > { %2010 = vmatpush.bf16.msra.mxu1 %v2962_v48 }
 0x1a2   : > { %v1515_v27 = vpop.f32.mrf.mxu2  ;;  %v1578_v49 = vpop.f32.mrf.mxu0 }
 0x1a3   : > { %v1516_v11 = vadd.f32 %v1515_v27, %v3982_v50  ;;  %v1564_v59 = vpop.f32.mrf.mxu3  ;;  %v1579_v0 = vadd.f32 %v1578_v49, %v4011_v9  ;;  %v1627_v26 = vpop.f32.mrf.mxu1  ;;  %v3141_v9 = vld [vmem:[%s4699_s2 + $0x244] sm:$0xf] }
 0x1a5   : > { %v4337_v34 = vadd.f32 %v1564_v59, %v1516_v11  ;;  %v1628_v61 = vadd.f32 %v1627_v26, %v1579_v0 }
 0x1a7   : > { %1869 = vmatmul.bf16.vlgmr.msrb.gmra.mxu2 %v3950_v62  ;;  %v2887_v62 = vld [vmem:[%s4699_s2 + $0x248] sm:$0xf0] }
 0x1a8   : > { %1918 = vmatmul.bf16.vlgmr.msrb.gmra.mxu3 %v3952_v18  ;;  %v2890_v18 = vor.u32 %v3141_v9, %v2887_v62 }
 0x1aa   : > { %v1581_v55 = vpop.f32.mrf.mxu0  ;;  %v1674_v35 = vpop.f32.mrf.mxu2  ;;  %1962 = vmatpush.bf16.msra.mxu0 %v2890_v18 }
 0x1ab   : > { %v1582_v25 = vadd.f32 %v1581_v55, %v4026_v28  ;;  %v1630_v13 = vpop.f32.mrf.mxu1  ;;  %v1675_v1 = vadd.f32 %v1674_v35, %v1626_v33  ;;  %v1723_v12 = vpop.f32.mrf.mxu3  ;;  %v3157_v28 = vld [vmem:[%s4699_s2 + $0x2c4] sm:$0xf]  ;;  %v2951_v33 = vld [vmem:[%s4699_s2 + $0x2c8] sm:$0xf0] }
 0x1ad   : > { %v1631_v50 = vadd.f32 %v1630_v13, %v1582_v25  ;;  %v1724_v63 = vadd.f32 %v1723_v12, %v1675_v1  ;;  %1776 = vmatmul.bf16.gmra.mxu0 %v3662_v7  ;;  %v2954_v7 = vor.u32 %v3157_v28, %v2951_v33 }
 0x1ae   : > { %1825 = vmatmul.bf16.gmra.mxu1 %v3664_v8 }
 0x1af   : > { %2011 = vmatpush.bf16.msra.mxu1 %v2954_v7  ;;  %v2057_v26 = vmax.f32 %v1724_v63, 0.0 }
 0x1b2   : > { %v1583_v40 = vpop.f32.mrf.mxu0  ;;  %v1676_v8 = vpop.f32.mrf.mxu2 }
 0x1b3   : > { %v1584_v48 = vadd.f32 %v1583_v40, %v4045_v31  ;;  %v1632_v27 = vpop.f32.mrf.mxu1  ;;  %v1677_v49 = vadd.f32 %v1676_v8, %v1628_v61  ;;  %v1725_v11 = vpop.f32.mrf.mxu3 }
 0x1b5   : > { %v1633_v59 = vadd.f32 %v1632_v27, %v1584_v48  ;;  %v1726_v0 = vadd.f32 %v1725_v11, %v1677_v49 }
 0x1b7   : > { %v2059_v55 = vmax.f32 %v1726_v0, 0.0  ;;  %1874 = vmatmul.bf16.gmra.mxu2 %v3987_v22  ;;  %v3139_v22 = vld [vmem:[%s4699_s2 + $0x234] sm:$0xf] }
 0x1b8   : > { %1923 = vmatmul.bf16.gmra.mxu3 %v3990_v32  ;;  %v2879_v32 = vld [vmem:[%s4699_s2 + $0x238] sm:$0xf0] }
 0x1b9   : > { %v4359_v35 = vpack.c.bf16 %v2059_v55, %v2057_v26  ;;  %v2882_v63 = vor.u32 %v3139_v22, %v2879_v32 }
 0x1ba   : > { %v1586_v25 = vpop.f32.mrf.mxu0  ;;  %v1679_v13 = vpop.f32.mrf.mxu2 }
 0x1bb   : > { %v1587_v1 = vadd.f32 %v1586_v25, %v4060_v51  ;;  %v1635_v12 = vpop.f32.mrf.mxu1  ;;  %v1680_v31 = vadd.f32 %v1679_v13, %v1631_v50  ;;  %v1728_v9 = vpop.f32.mrf.mxu3  ;;  %v3155_v51 = vld [vmem:[%s4699_s2 + $0x2b4] sm:$0xf]  ;;  %v2943_v50 = vld [vmem:[%s4699_s2 + $0x2b8] sm:$0xf0]  ;;  %1963 = vmatpush.bf16.msra.mxu0 %v2882_v63 }
 0x1bd   : > { %v1636_v61 = vadd.f32 %v1635_v12, %v1587_v1  ;;  %v1729_v62 = vadd.f32 %v1728_v9, %v1680_v31  ;;  %1781 = vmatmul.bf16.gmra.mxu0 %v3692_v29  ;;  %v2946_v29 = vor.u32 %v3155_v51, %v2943_v50  ;;  %v2935_v31 = vld [vmem:[%s4699_s2 + $0x2a8] sm:$0xf0] }
 0x1be   : > { %1830 = vmatmul.bf16.gmra.mxu1 %v3694_v30 }
 0x1bf   : > { %2012 = vmatpush.bf16.msra.mxu1 %v2946_v29  ;;  %v2061_v27 = vmax.f32 %v1729_v62, 0.0 }
 0x1c2   : > { %v1588_v18 = vpop.f32.mrf.mxu0  ;;  %v1681_v30 = vpop.f32.mrf.mxu2 }
 0x1c3   : > { %v1589_v28 = vadd.f32 %v1588_v18, %v4079_v57  ;;  %v1637_v33 = vpop.f32.mrf.mxu1  ;;  %v1682_v7 = vadd.f32 %v1681_v30, %v1633_v59  ;;  %v1730_v40 = vpop.f32.mrf.mxu3 }
 0x1c5   : > { %v1638_v8 = vadd.f32 %v1637_v33, %v1589_v28  ;;  %v1731_v48 = vadd.f32 %v1730_v40, %v1682_v7 }
 0x1c7   : > { %v2063_v49 = vmax.f32 %v1731_v48, 0.0  ;;  %1879 = vmatmul.bf16.gmra.mxu2 %v4021_v58  ;;  %v3137_v58 = vld [vmem:[%s4699_s2 + $0x224] sm:$0xf] }
 0x1c8   : > { %1928 = vmatmul.bf16.gmra.mxu3 %v4024_v46  ;;  %v2871_v46 = vld [vmem:[%s4699_s2 + $0x228] sm:$0xf0] }
 0x1c9   : > { %v4379_v11 = vpack.c.bf16 %v2063_v49, %v2061_v27  ;;  %v2874_v12 = vor.u32 %v3137_v58, %v2871_v46  ;;  %v2927_v49 = vld [vmem:[%s4699_s2 + $0x298] sm:$0xf0] }
 0x1ca   : > { %v1591_v0 = vpop.f32.mrf.mxu0  ;;  %v1684_v26 = vpop.f32.mrf.mxu2  ;;  %v3172_v46 = vld [vmem:[%s4701_s4 + $0x38] sm:$0xff] }
 0x1cb   : > { %v1592_v55 = vadd.f32 %v1591_v0, %v4094_v19  ;;  %v1640_v25 = vpop.f32.mrf.mxu1  ;;  %v1685_v57 = vadd.f32 %v1684_v26, %v1636_v61  ;;  %v1733_v13 = vpop.f32.mrf.mxu3  ;;  %v3153_v19 = vld [vmem:[%s4699_s2 + $0x2a4] sm:$0xf]  ;;  %1964 = vmatpush.bf16.msra.mxu0 %v2874_v12  ;;  %2237 = vmatpush.bf16.msra.mxu2 %v3172_v46 }
 0x1cd   : > { %v1641_v59 = vadd.f32 %v1640_v25, %v1592_v55  ;;  %v1734_v1 = vadd.f32 %v1733_v13, %v1685_v57  ;;  %1786 = vmatmul.bf16.gmra.mxu0 %v3722_v52  ;;  %v2938_v52 = vor.u32 %v3153_v19, %v2935_v31 }
 0x1ce   : > { %1835 = vmatmul.bf16.gmra.mxu1 %v3724_v56 }
 0x1cf   : > { %2013 = vmatpush.bf16.msra.mxu1 %v2938_v52  ;;  %v2065_v50 = vmax.f32 %v1734_v1, 0.0 }
 0x1d2   : > { %v1593_v9 = vpop.f32.mrf.mxu0  ;;  %v1686_v56 = vpop.f32.mrf.mxu2 }
 0x1d3   : > { %v1594_v61 = vadd.f32 %v1593_v9, %v4113_v21  ;;  %v1642_v62 = vpop.f32.mrf.mxu1  ;;  %v1687_v22 = vadd.f32 %v1686_v56, %v1638_v8  ;;  %v1735_v32 = vpop.f32.mrf.mxu3  ;;  %v3171_v56 = vld [vmem:[%s4701_s4 + $0x30] sm:$0xff] }
 0x1d4   : > { %2238 = vmatpush.bf16.msra.mxu2 %v3171_v56 }
 0x1d5   : > { %v1643_v63 = vadd.f32 %v1642_v62, %v1594_v61  ;;  %v1736_v51 = vadd.f32 %v1735_v32, %v1687_v22  ;;  %v3133_v61 = vld [vmem:[%s4699_s2 + $0x204] sm:$0xf]  ;;  %v3170_v62 = vld [vmem:[%s4701_s4 + $0x28] sm:$0xff] }
 0x1d7   : > { %v2067_v29 = vmax.f32 %v1736_v51, 0.0  ;;  %1884 = vmatmul.bf16.gmra.mxu2 %v4055_v6  ;;  %v3135_v6 = vld [vmem:[%s4699_s2 + $0x214] sm:$0xf] }
 0x1d8   : > { %1933 = vmatmul.bf16.gmra.mxu3 %v4058_v53  ;;  %v2863_v53 = vld [vmem:[%s4699_s2 + $0x218] sm:$0xf0]  ;;  %2239 = vmatpush.bf16.msra.mxu2 %v3170_v62  ;;  %v4736_v62 = vld [vmem:[#allocation4_spill] sm:$0xff] }
 0x1d9   : > { %v4399_v18 = vpack.c.bf16 %v2067_v29, %v2065_v50  ;;  %v2866_v27 = vor.u32 %v3135_v6, %v2863_v53  ;;  %v3168_v6 = vld [vmem:[%s4701_s4 + $0x18] sm:$0xff] }
 0x1da   : > { %v1596_v30 = vpop.f32.mrf.mxu0  ;;  %v1689_v28 = vpop.f32.mrf.mxu2 }
 0x1db   : > { %v1597_v33 = vadd.f32 %v1596_v30, %v4152_v14  ;;  %v1645_v7 = vpop.f32.mrf.mxu1  ;;  %v1690_v21 = vadd.f32 %v1689_v28, %v1641_v59  ;;  %v1738_v40 = vpop.f32.mrf.mxu3  ;;  %v3151_v14 = vld [vmem:[%s4699_s2 + $0x294] sm:$0xf]  ;;  %1965 = vmatpush.bf16.msra.mxu0 %v2866_v27 }
 0x1dd   : > { %v1646_v8 = vadd.f32 %v1645_v7, %v1597_v33  ;;  %v1739_v48 = vadd.f32 %v1738_v40, %v1690_v21  ;;  %1791 = vmatmul.bf16.gmra.mxu0 %v3752_v20  ;;  %v2930_v20 = vor.u32 %v3151_v14, %v2927_v49  ;;  %v3169_v7 = vld [vmem:[%s4701_s4 + $0x20] sm:$0xff] }
 0x1de   : > { %1840 = vmatmul.bf16.gmra.mxu1 %v3754_v4  ;;  %2240 = vmatpush.bf16.msra.mxu2 %v3169_v7 }
 0x1df   : > { %2014 = vmatpush.bf16.msra.mxu1 %v2930_v20  ;;  %v2069_v1 = vmax.f32 %v1739_v48, 0.0 }
 0x1e2   : > { %v1598_v0 = vpop.f32.mrf.mxu0  ;;  %v1691_v4 = vpop.f32.mrf.mxu2  ;;  %2241 = vmatpush.bf16.msra.mxu2 %v3168_v6 }
 0x1e3   : > { %v1599_v26 = vadd.f32 %v1598_v0, %v4195_v42  ;;  %v1647_v55 = vpop.f32.mrf.mxu1  ;;  %v1692_v25 = vadd.f32 %v1691_v4, %v1643_v63  ;;  %v1740_v57 = vpop.f32.mrf.mxu3  ;;  %v3167_v0 = vld [vmem:[%s4701_s4 + $0x10] sm:$0xff]  ;;  %v4734_v4 = vld [vmem:[#allocation2_spill] sm:$0xff] }
 0x1e5   : > { %v1648_v13 = vadd.f32 %v1647_v55, %v1599_v26  ;;  %v1741_v59 = vadd.f32 %v1740_v57, %v1692_v25  ;;  %v3166_v26 = vld [vmem:[%s4701_s4 + $0x8] sm:$0xff] }
 0x1e6   : > { %2242 = vmatpush.bf16.msra.mxu2 %v3167_v0 }
 0x1e7   : > { %v2071_v58 = vmax.f32 %v1741_v59, 0.0  ;;  %1889 = vmatmul.bf16.gmra.mxu2 %v4089_v47 }
 0x1e8   : > { %1938 = vmatmul.bf16.gmra.mxu3 %v4092_v24 }
 0x1e9   : > { %v4422_v12 = vpack.c.bf16 %v2071_v58, %v2069_v1 }
 0x1ea   : > { %v1601_v42 = vpop.f32.mrf.mxu0  ;;  %v1694_v19 = vpop.f32.mrf.mxu2  ;;  %2243 = vmatpush.bf16.msra.mxu2 %v3166_v26 }
 0x1eb   : > { %v1602_v31 = vadd.f32 %v1601_v42, %v4234_v43  ;;  %v1650_v52 = vpop.f32.mrf.mxu1  ;;  %v1743_v9 = vpop.f32.mrf.mxu3  ;;  %v1695_v24 = vadd.f32 %v1694_v19, %v1646_v8  ;;  %v2855_v43 = vld [vmem:[%s4699_s2 + $0x208] sm:$0xf0] }
 0x1ec   : > { %v2858_v22 = vor.u32 %v3133_v61, %v2855_v43  ;;  %v4735_v61 = vld [vmem:[#allocation3_spill] sm:$0xff]  ;;  %v3180_v43 = vld [vmem:[%s4701_s4 + $0x78] sm:$0xff] }
 0x1ed   : > { %v1651_v47 = vadd.f32 %v1650_v52, %v1602_v31  ;;  %1796 = vmatmul.bf16.gmra.mxu0 %v3830_v38  ;;  %v3149_v38 = vld [vmem:[%s4699_s2 + $0x284] sm:$0xf]  ;;  %v1744_v50 = vadd.f32 %v1743_v9, %v1695_v24  ;;  %2286 = vmatpush.bf16.msra.mxu3 %v3180_v43 }
 0x1ee   : > { %1845 = vmatmul.bf16.gmra.mxu1 %v3832_v39  ;;  %v2919_v39 = vld [vmem:[%s4699_s2 + $0x288] sm:$0xf0]  ;;  %1966 = vmatpush.bf16.msra.mxu0 %v2858_v22  ;;  %v3177_v43 = vld [vmem:[%s4701_s4 + $0x60] sm:$0xff] }
 0x1ef   : > { %v2922_v32 = vor.u32 %v3149_v38, %v2919_v39  ;;  %v2073_v8 = vmax.f32 %v1744_v50, 0.0 }
 0x1f1   : > { %2015 = vmatpush.bf16.msra.mxu1 %v2922_v32 }
 0x1f2   : > { %v1603_v63 = vpop.f32.mrf.mxu0  ;;  %v1696_v51 = vpop.f32.mrf.mxu2 }
 0x1f3   : > { %v1604_v29 = vadd.f32 %v1603_v63, %v4277_v10  ;;  %v1652_v30 = vpop.f32.mrf.mxu1  ;;  %v1697_v28 = vadd.f32 %v1696_v51, %v1648_v13  ;;  %v1745_v33 = vpop.f32.mrf.mxu3 }
 0x1f5   : > { %v1653_v21 = vadd.f32 %v1652_v30, %v1604_v29  ;;  %v1746_v40 = vadd.f32 %v1745_v33, %v1697_v28  ;;  %v3190_v28 = vld [vmem:[%s4700_s3] sm:$0x3] }
 0x1f6   : > { %v4484_v33 = vperm.slane %v3190_v28, 1 }
 0x1f7   : > { %v2075_v48 = vmax.f32 %v1746_v40, 0.0  ;;  %1894 = vmatmul.bf16.gmra.mxu2 %v4144_v16 }
 0x1f8   : > { %1943 = vmatmul.bf16.gmra.mxu3 %v4150_v54 }
 0x1f9   : > { %v4454_v10 = vpack.c.bf16 %v2075_v48, %v2073_v8 }
 0x1fa   : > { %v1606_v53 = vpop.f32.mrf.mxu0  ;;  %v1699_v27 = vpop.f32.mrf.mxu2 }
 0x1fb   : > { %v1607_v14 = vadd.f32 %v1606_v53, %v4292_v23  ;;  %v1655_v49 = vpop.f32.mrf.mxu1  ;;  %v1748_v20 = vpop.f32.mrf.mxu3  ;;  %v1700_v54 = vadd.f32 %v1699_v27, %v1651_v47  ;;  %v4737_v53 = vld [vmem:[#allocation5_spill] sm:$0xff]  ;;  %v4738_v27 = vld [vmem:[#allocation6_spill] sm:$0xff] }
 0x1fd   : > { %v1656_v16 = vadd.f32 %v1655_v49, %v1607_v14  ;;  %1801 = vmatmul.bf16.gmra.mxu0 %v3908_v5  ;;  %v1749_v25 = vadd.f32 %v1748_v20, %v1700_v54  ;;  %v3165_v5 = vld [vmem:[%s4701_s4] sm:$0xff] }
 0x1fe   : > { %1850 = vmatmul.bf16.gmra.mxu1 %v4734_v4  ;;  %2244 = vmatpush.bf16.msra.mxu2 %v3165_v5 }
 0x1ff   : > { %v2077_v42 = vmax.f32 %v1749_v25, 0.0 }
 0x202   : > { %v1608_v55 = vpop.f32.mrf.mxu0  ;;  %v1701_v23 = vpop.f32.mrf.mxu2 }
 0x203   : > { %v1609_v57 = vadd.f32 %v1608_v55, %v4311_v36  ;;  %v1657_v13 = vpop.f32.mrf.mxu1  ;;  %v1702_v59 = vadd.f32 %v1701_v23, %v1653_v21  ;;  %v1750_v1 = vpop.f32.mrf.mxu3 }
 0x205   : > { %v1658_v58 = vadd.f32 %v1657_v13, %v1609_v57  ;;  %v1751_v46 = vadd.f32 %v1750_v1, %v1702_v59 }
 0x207   : > { %v2079_v19 = vmax.f32 %v1751_v46, 0.0  ;;  %1899 = vmatmul.bf16.gmra.mxu2 %v4226_v37  ;;  %v3178_v46 = vld [vmem:[%s4701_s4 + $0x68] sm:$0xff] }
 0x208   : > { %1948 = vmatmul.bf16.gmra.mxu3 %v4232_v17 }
 0x209   : > { %v4471_v31 = vpack.c.bf16 %v2079_v19, %v2077_v42  ;;  %v4740_v42 = vld [vmem:[#allocation8_spill] sm:$0xff] }
 0x20a   : > { %v1611_v52 = vpop.f32.mrf.mxu0  ;;  %v1704_v36 = vpop.f32.mrf.mxu2 }
 0x20b   : > { %v1612_v9 = vadd.f32 %v1611_v52, %v4319_v3  ;;  %v1660_v56 = vpop.f32.mrf.mxu1  ;;  %v1753_v47 = vpop.f32.mrf.mxu3  ;;  %v1705_v37 = vadd.f32 %v1704_v36, %v1656_v16 }
 0x20d   : > { %v1661_v24 = vadd.f32 %v1660_v56, %v1612_v9  ;;  %1806 = vmatmul.bf16.gmra.mxu0 %v4735_v61  ;;  %v1754_v38 = vadd.f32 %v1753_v47, %v1705_v37  ;;  %v4741_v61 = vld [vmem:[#allocation9_spill] sm:$0xff] }
 0x20e   : > { %1855 = vmatmul.bf16.gmra.mxu1 %v4736_v62  ;;  %v4742_v62 = vld [vmem:[#allocation10_spill] sm:$0xff] }
 0x20f   : > { %v2081_v29 = vmax.f32 %v1754_v38, 0.0 }
 0x212   : > { %v1613_v17 = vpop.f32.mrf.mxu0  ;;  %v1706_v22 = vpop.f32.mrf.mxu2 }
 0x213   : > { %v1614_v39 = vadd.f32 %v1613_v17, %v4337_v34  ;;  %v1662_v32 = vpop.f32.mrf.mxu1  ;;  %v1707_v3 = vadd.f32 %v1706_v22, %v1658_v58  ;;  %v1755_v63 = vpop.f32.mrf.mxu3  ;;  %v4739_v58 = vld [vmem:[#allocation7_spill] sm:$0xff] }
 0x215   : > { %v1663_v51 = vadd.f32 %v1662_v32, %v1614_v39  ;;  %v1756_v50 = vadd.f32 %v1755_v63, %v1707_v3  ;;  %v4743_v63 = vld [vmem:[#allocation11_spill] sm:$0xff] }
 0x217   : > { %v2083_v30 = vmax.f32 %v1756_v50, 0.0  ;;  %1904 = vmatmul.bf16.gmra.mxu2 %v4287_v41  ;;  %v3179_v41 = vld [vmem:[%s4701_s4 + $0x70] sm:$0xff] }
 0x218   : > { %1953 = vmatmul.bf16.gmra.mxu3 %v4290_v45  ;;  %v4744_v50 = vld [vmem:[#allocation12_spill] sm:$0xff] }
 0x219   : > { %v4487_v7 = vpack.c.bf16 %v2083_v30, %v2081_v29  ;;  %2287 = vmatpush.bf16.msra.mxu3 %v3179_v41  ;;  %v4745_v41 = vld [vmem:[#allocation13_spill] sm:$0xff] }
 0x21a   : > { %v1709_v34 = vpop.f32.mrf.mxu2  ;;  %v1772_v21 = vpop.f32.mrf.mxu0 }
 0x21b   : > { %v1758_v40 = vpop.f32.mrf.mxu3  ;;  %v1773_v8 = vadd.f32 %v1772_v21, %v4484_v33  ;;  %v1821_v48 = vpop.f32.mrf.mxu1  ;;  %v1710_v14 = vadd.f32 %v1709_v34, %v1661_v24 }
 0x21d   : > { %v4490_v6 = vadd.f32 %v1821_v48, %v1773_v8  ;;  %1967 = vmatmul.bf16.vlgmr.msra.gmra.mxu0 %v4737_v53  ;;  %v1759_v20 = vadd.f32 %v1758_v40, %v1710_v14  ;;  %2288 = vmatpush.bf16.msra.mxu3 %v3178_v46  ;;  %v4746_v14 = vld [vmem:[#allocation14_spill] sm:$0xff] }
 0x21e   : > { %2016 = vmatmul.bf16.vlgmr.msra.gmra.mxu1 %v4738_v27  ;;  %v3175_v27 = vld [vmem:[%s4701_s4 + $0x50] sm:$0xff] }
 0x21f   : > { %v2085_v23 = vmax.f32 %v1759_v20, 0.0 }
 0x221   : > { %2289 = vmatpush.bf16.msra.mxu3 %v3177_v43 }
 0x222   : > { %v1711_v45 = vpop.f32.mrf.mxu2  ;;  %v1774_v49 = vpop.f32.mrf.mxu0 }
 0x223   : > { %v1712_v0 = vadd.f32 %v1711_v45, %v1663_v51  ;;  %v1775_v16 = vadd.f32 %v1774_v49, %v4484_v33  ;;  %v1823_v4 = vpop.f32.mrf.mxu1  ;;  %v1760_v54 = vpop.f32.mrf.mxu3  ;;  %v3176_v51 = vld [vmem:[%s4701_s4 + $0x58] sm:$0xff] }
 0x225   : > { %v1761_v26 = vadd.f32 %v1760_v54, %v1712_v0  ;;  %v4498_v55 = vadd.f32 %v1823_v4, %v1775_v16  ;;  %2290 = vmatpush.bf16.msra.mxu3 %v3176_v51 }
 0x227   : > { %v2087_v25 = vmax.f32 %v1761_v26, 0.0  ;;  %2245 = vmatmul.bf16.vlgmr.msra.gmra.mxu2 %v4359_v35 }
 0x229   : > { %v4501_v57 = vpack.c.bf16 %v2087_v25, %v2085_v23  ;;  %2291 = vmatpush.bf16.msra.mxu3 %v3175_v27  ;;  %v4747_v23 = vld [vmem:[#allocation15_spill] sm:$0xff] }
 0x22a   : > { %v1777_v13 = vpop.f32.mrf.mxu0  ;;  %v4535_v29 = vpop.f32.mrf.mxu2  ;;  %v3174_v25 = vld [vmem:[%s4701_s4 + $0x48] sm:$0xff] }
 0x22b   : > { %v1778_v59 = vadd.f32 %v1777_v13, %v4484_v33  ;;  %v1826_v1 = vpop.f32.mrf.mxu1  ;;  %v4748_v13 = vld [vmem:[#allocation16_spill] sm:$0xff] }
 0x22d   : > { %v4504_v5 = vadd.f32 %v1826_v1, %v1778_v59  ;;  %1972 = vmatmul.bf16.gmra.mxu0 %v4739_v58  ;;  %2292 = vmatpush.bf16.msra.mxu3 %v3174_v25 }
 0x22e   : > { %2021 = vmatmul.bf16.gmra.mxu1 %v4740_v42 }
 0x232   : > { %v1779_v19 = vpop.f32.mrf.mxu0  ;;  %v4541_v40 = vpop.f32.mrf.mxu2 }
 0x233   : > { %v1780_v35 = vadd.f32 %v1779_v19, %v4484_v33  ;;  %v1828_v52 = vpop.f32.mrf.mxu1  ;;  %v1919_v19 = vpop.f32.mrf.mxu3 }
 0x235   : > { %v4512_v36 = vadd.f32 %v1828_v52, %v1780_v35 }
 0x237   : > { %2250 = vmatmul.bf16.gmra.mxu2 %v4379_v11 }
 0x23a   : > { %v1782_v9 = vpop.f32.mrf.mxu0  ;;  %v4552_v20 = vpop.f32.mrf.mxu2 }
 0x23b   : > { %v1783_v56 = vadd.f32 %v1782_v9, %v4484_v33  ;;  %v1831_v47 = vpop.f32.mrf.mxu1 }
 0x23d   : > { %v4516_v24 = vadd.f32 %v1831_v47, %v1783_v56  ;;  %1977 = vmatmul.bf16.gmra.mxu0 %v4741_v61  ;;  %v3173_v47 = vld [vmem:[%s4701_s4 + $0x40] sm:$0xff] }
 0x23e   : > { %2026 = vmatmul.bf16.gmra.mxu1 %v4742_v62  ;;  %2293 = vmatpush.bf16.msra.mxu3 %v3173_v47 }
 0x242   : > { %v1784_v37 = vpop.f32.mrf.mxu0  ;;  %v1877_v59 = vpop.f32.mrf.mxu2 }
 0x243   : > { %v1785_v17 = vadd.f32 %v1784_v37, %v4484_v33  ;;  %v1833_v22 = vpop.f32.mrf.mxu1  ;;  %v1921_v37 = vpop.f32.mrf.mxu3 }
 0x245   : > { %v4524_v11 = vadd.f32 %v1833_v22, %v1785_v17 }
 0x247   : > { %2255 = vmatmul.bf16.gmra.mxu2 %v4399_v18 }
 0x24a   : > { %v1787_v38 = vpop.f32.mrf.mxu0  ;;  %v4569_v42 = vpop.f32.mrf.mxu2 }
 0x24b   : > { %v1788_v39 = vadd.f32 %v1787_v38, %v4484_v33  ;;  %v1836_v32 = vpop.f32.mrf.mxu1 }
 0x24d   : > { %v4528_v3 = vadd.f32 %v1836_v32, %v1788_v39  ;;  %1982 = vmatmul.bf16.gmra.mxu0 %v4743_v63  ;;  %v1924_v32 = vpop.f32.mrf.mxu3 }
 0x24e   : > { %2031 = vmatmul.bf16.gmra.mxu1 %v4744_v50 }
 0x252   : > { %v1789_v30 = vpop.f32.mrf.mxu0 }
 0x253   : > { %v1790_v18 = vadd.f32 %v1789_v30, %v4484_v33  ;;  %v1838_v28 = vpop.f32.mrf.mxu1 }
 0x255   : > { %v4538_v34 = vadd.f32 %v1838_v28, %v1790_v18  ;;  %v1926_v18 = vpop.f32.mrf.mxu3  ;;  %v1871_v28 = vadd.f32 %v4535_v29, %v4490_v6 }
 0x257   : > { %2260 = vmatmul.bf16.gmra.mxu2 %v4422_v12 }
 0x25a   : > { %v1792_v21 = vpop.f32.mrf.mxu0 }
 0x25b   : > { %v1793_v8 = vadd.f32 %v1792_v21, %v4484_v33  ;;  %v1841_v48 = vpop.f32.mrf.mxu1 }
 0x25d   : > { %v4544_v53 = vadd.f32 %v1841_v48, %v1793_v8  ;;  %1987 = vmatmul.bf16.gmra.mxu0 %v4745_v41  ;;  %v1920_v48 = vadd.f32 %v1919_v19, %v1871_v28  ;;  %v1929_v27 = vpop.f32.mrf.mxu3 }
 0x25e   : > { %2036 = vmatmul.bf16.gmra.mxu1 %v4746_v14 }
 0x262   : > { %v1794_v45 = vpop.f32.mrf.mxu0 }
 0x263   : > { %v1795_v12 = vadd.f32 %v1794_v45, %v4484_v33  ;;  %v1843_v49 = vpop.f32.mrf.mxu1 }
 0x265   : > { %v4554_v0 = vadd.f32 %v1843_v49, %v1795_v12 }
 0x267   : > { %2265 = vmatmul.bf16.gmra.mxu2 %v4454_v10 }
 0x26a   : > { %v1797_v16 = vpop.f32.mrf.mxu0 }
 0x26b   : > { %v1798_v4 = vadd.f32 %v1797_v16, %v4484_v33  ;;  %v1846_v54 = vpop.f32.mrf.mxu1 }
 0x26d   : > { %v4558_v26 = vadd.f32 %v1846_v54, %v1798_v4  ;;  %1992 = vmatmul.bf16.gmra.mxu0 %v4747_v23  ;;  %v1876_v4 = vadd.f32 %v4552_v20, %v4504_v5  ;;  %v1931_v23 = vpop.f32.mrf.mxu3  ;;  %v1881_v5 = vadd.f32 %v4569_v42, %v4516_v24 }
 0x26e   : > { %2041 = vmatmul.bf16.gmra.mxu1 %v4748_v13 }
 0x26f   : > { %v1925_v25 = vadd.f32 %v1924_v32, %v1876_v4 }
 0x272   : > { %v1799_v1 = vpop.f32.mrf.mxu0 }
 0x273   : > { %v1800_v58 = vadd.f32 %v1799_v1, %v4484_v33  ;;  %v1848_v10 = vpop.f32.mrf.mxu1 }
 0x275   : > { %v4566_v46 = vadd.f32 %v1848_v10, %v1800_v58 }
 0x277   : > { %2270 = vmatmul.bf16.gmra.mxu2 %v4471_v31  ;;  %v1882_v31 = vpop.f32.mrf.mxu2 }
 0x27a   : > { %v1802_v35 = vpop.f32.mrf.mxu0 }
 0x27b   : > { %v1803_v52 = vadd.f32 %v1802_v35, %v4484_v33  ;;  %v1851_v9 = vpop.f32.mrf.mxu1 }
 0x27d   : > { %v4572_v56 = vadd.f32 %v1851_v9, %v1803_v52  ;;  %1997 = vmatmul.bf16.gmra.mxu0 %v4275_v15  ;;  %v1934_v52 = vpop.f32.mrf.mxu3 }
 0x27e   : > { %2046 = vmatmul.bf16.gmra.mxu1 %v4279_v44 }
 0x27f   : > { %v4584_v44 = vpop.f32.mrf.mxu2 }
 0x280   : > { %v1886_v24 = vadd.f32 %v4584_v44, %v4528_v3 }
 0x282   : > { %v1804_v61 = vpop.f32.mrf.mxu0 }
 0x283   : > { %v1805_v43 = vadd.f32 %v1804_v61, %v4484_v33  ;;  %v1853_v62 = vpop.f32.mrf.mxu1 }
 0x285   : > { %v4580_v17 = vadd.f32 %v1853_v62, %v1805_v43 }
 0x287   : > { %2275 = vmatmul.bf16.gmra.mxu2 %v4487_v7  ;;  %v1887_v7 = vpop.f32.mrf.mxu2 }
 0x28a   : > { %v1807_v22 = vpop.f32.mrf.mxu0 }
 0x28b   : > { %v1808_v15 = vadd.f32 %v1807_v22, %v4484_v33  ;;  %v1856_v38 = vpop.f32.mrf.mxu1  ;;  %v1936_v22 = vpop.f32.mrf.mxu3 }
 0x28d   : > { %v4586_v39 = vadd.f32 %v1856_v38, %v1808_v15  ;;  %2002 = vmatmul.bf16.gmra.mxu0 %v4309_v2  ;;  %v1873_v2 = vadd.f32 %v4541_v40, %v4498_v55  ;;  %v1878_v55 = vadd.f32 %v1877_v59, %v4512_v36  ;;  %v1883_v36 = vadd.f32 %v1882_v31, %v4524_v11 }
 0x28e   : > { %2051 = vmatmul.bf16.gmra.mxu1 %v4313_v60  ;;  %v1935_v11 = vadd.f32 %v1934_v52, %v1886_v24  ;;  %v1888_v31 = vadd.f32 %v1887_v7, %v4538_v34 }
 0x28f   : > { %v1922_v41 = vadd.f32 %v1921_v37, %v1873_v2  ;;  %v1927_v13 = vadd.f32 %v1926_v18, %v1878_v55  ;;  %v1890_v62 = vpop.f32.mrf.mxu2  ;;  %v1930_v37 = vadd.f32 %v1929_v27, %v1881_v5  ;;  %v1932_v15 = vadd.f32 %v1931_v23, %v1883_v36 }
 0x290   : > { %v1937_v27 = vadd.f32 %v1936_v22, %v1888_v31  ;;  %v1891_v3 = vadd.f32 %v1890_v62, %v4544_v53 }
 0x292   : > { %v1809_v63 = vpop.f32.mrf.mxu0 }
 0x293   : > { %v1810_v51 = vadd.f32 %v1809_v63, %v4484_v33  ;;  %v1858_v50 = vpop.f32.mrf.mxu1 }
 0x295   : > { %v4591_v30 = vadd.f32 %v1858_v50, %v1810_v51 }
 0x297   : > { %2280 = vmatmul.bf16.gmra.mxu2 %v4501_v57  ;;  %v1892_v18 = vpop.f32.mrf.mxu2 }
 0x298   : > { %v1893_v34 = vadd.f32 %v1892_v18, %v4554_v0 }
 0x29a   : > { %v1968_v21 = vpop.f32.mrf.mxu0 }
 0x29b   : > { %v2017_v8 = vpop.f32.mrf.mxu1  ;;  %v1969_v60 = vadd.f32 %v1968_v21, %v1920_v48 }
 0x29d   : > { %v2018_v14 = vadd.f32 %v2017_v8, %v1969_v60  ;;  %v1939_v8 = vpop.f32.mrf.mxu3 }
 0x29e   : > { %v1940_v23 = vadd.f32 %v1939_v8, %v1891_v3 }
 0x29f   : > { %v2058_v16 = vmax.f32 %v2018_v14, 0.0 }
 0x2a2   : > { %v1970_v33 = vpop.f32.mrf.mxu0 }
 0x2a3   : > { %v1971_v45 = vadd.f32 %v1970_v33, %v1922_v41  ;;  %v2019_v12 = vpop.f32.mrf.mxu1  ;;  %v1895_v41 = vpop.f32.mrf.mxu2 }
 0x2a5   : > { %v2020_v49 = vadd.f32 %v2019_v12, %v1971_v45 }
 0x2a7   : > { %v2060_v57 = vmax.f32 %v2020_v49, 0.0  ;;  %v1941_v49 = vpop.f32.mrf.mxu3 }
 0x2a8   : > { %v1942_v55 = vadd.f32 %v1941_v49, %v1893_v34 }
 0x2a9   : > { %v2090_v6 = vpack.c.bf16 %v2060_v57, %v2058_v16 }
 0x2aa   : > { %v1973_v29 = vpop.f32.mrf.mxu0 }
 0x2ab   : > { %v2022_v54 = vpop.f32.mrf.mxu1  ;;  %2294 = vmatmul.bf16.vlgmr.msra.gmra.mxu3 %v2090_v6  ;;  %v1974_v40 = vadd.f32 %v1973_v29, %v1925_v25  ;;  %v1897_v6 = vpop.f32.mrf.mxu2 }
 0x2ac   : > { %v1898_v0 = vadd.f32 %v1897_v6, %v4566_v46 }
 0x2ad   : > { %v2023_v58 = vadd.f32 %v2022_v54, %v1974_v40 }
 0x2af   : > { %v2062_v9 = vmax.f32 %v2023_v58, 0.0  ;;  %v1944_v7 = vpop.f32.mrf.mxu3 }
 0x2b2   : > { %v1975_v1 = vpop.f32.mrf.mxu0 }
 0x2b3   : > { %v1976_v10 = vadd.f32 %v1975_v1, %v1927_v13  ;;  %v2024_v19 = vpop.f32.mrf.mxu1 }
 0x2b5   : > { %v2025_v35 = vadd.f32 %v2024_v19, %v1976_v10  ;;  %v1900_v10 = vpop.f32.mrf.mxu2 }
 0x2b7   : > { %v2064_v47 = vmax.f32 %v2025_v35, 0.0  ;;  %v1946_v53 = vpop.f32.mrf.mxu3 }
 0x2b9   : > { %v2092_v20 = vpack.c.bf16 %v2064_v47, %v2062_v9  ;;  %v1896_v9 = vadd.f32 %v1895_v41, %v4558_v26  ;;  %v1901_v26 = vadd.f32 %v1900_v10, %v4572_v56 }
 0x2ba   : > { %v1978_v61 = vpop.f32.mrf.mxu0 }
 0x2bb   : > { %v2027_v43 = vpop.f32.mrf.mxu1  ;;  %2299 = vmatmul.bf16.gmra.mxu3 %v2092_v20  ;;  %v1979_v59 = vadd.f32 %v1978_v61, %v1930_v37  ;;  %v1945_v61 = vadd.f32 %v1944_v7, %v1896_v9  ;;  %v1947_v37 = vadd.f32 %v1946_v53, %v1898_v0 }
 0x2bd   : > { %v2028_v32 = vadd.f32 %v2027_v43, %v1979_v59  ;;  %v1902_v43 = vpop.f32.mrf.mxu2 }
 0x2bf   : > { %v2066_v28 = vmax.f32 %v2028_v32, 0.0  ;;  %v1949_v36 = vpop.f32.mrf.mxu3 }
 0x2c0   : > { %v1950_v46 = vadd.f32 %v1949_v36, %v1901_v26 }
 0x2c2   : > { %v1980_v38 = vpop.f32.mrf.mxu0 }
 0x2c3   : > { %v1981_v63 = vadd.f32 %v1980_v38, %v1932_v15  ;;  %v2029_v51 = vpop.f32.mrf.mxu1 }
 0x2c5   : > { %v2030_v50 = vadd.f32 %v2029_v51, %v1981_v63 }
 0x2c7   : > { %v2068_v21 = vmax.f32 %v2030_v50, 0.0  ;;  %v1905_v50 = vpop.f32.mrf.mxu2  ;;  %v1951_v24 = vpop.f32.mrf.mxu3 }
 0x2c8   : > { %v1906_v56 = vadd.f32 %v1905_v50, %v4586_v39 }
 0x2c9   : > { %v2094_v42 = vpack.c.bf16 %v2068_v21, %v2066_v28 }
 0x2ca   : > { %v1983_v48 = vpop.f32.mrf.mxu0 }
 0x2cb   : > { %v2032_v2 = vpop.f32.mrf.mxu1  ;;  %2304 = vmatmul.bf16.gmra.mxu3 %v2094_v42  ;;  %v1984_v60 = vadd.f32 %v1983_v48, %v1935_v11  ;;  %v1903_v42 = vadd.f32 %v1902_v43, %v4580_v17 }
 0x2cd   : > { %v2033_v14 = vadd.f32 %v2032_v2, %v1984_v60  ;;  %v1952_v48 = vadd.f32 %v1951_v24, %v1903_v42 }
 0x2cf   : > { %v2070_v57 = vmax.f32 %v2033_v14, 0.0  ;;  %v1907_v2 = vpop.f32.mrf.mxu2 }
 0x2d0   : > { %v1908_v17 = vadd.f32 %v1907_v2, %v4591_v30  ;;  %v4618_v30 = vld [vmem:[%s4702_s5] ss:$0 sm:$0xff] }
 0x2d2   : > { %v1985_v33 = vpop.f32.mrf.mxu0 }
 0x2d3   : > { %v1986_v45 = vadd.f32 %v1985_v33, %v1937_v27  ;;  %v2034_v12 = vpop.f32.mrf.mxu1  ;;  %v1954_v33 = vpop.f32.mrf.mxu3 }
 0x2d5   : > { %v2035_v16 = vadd.f32 %v2034_v12, %v1986_v45 }
 0x2d7   : > { %v2072_v4 = vmax.f32 %v2035_v16, 0.0 }
 0x2d9   : > { %v2096_v44 = vpack.c.bf16 %v2072_v4, %v2070_v57  ;;  %v2246_v57 = vpop.f32.mrf.mxu2  ;;  %v1955_v4 = vadd.f32 %v1954_v33, %v1906_v56 }
 0x2da   : > { %v1988_v29 = vpop.f32.mrf.mxu0 }
 0x2db   : > { %v2037_v54 = vpop.f32.mrf.mxu1  ;;  %2309 = vmatmul.bf16.gmra.mxu3 %v2096_v44  ;;  %v1989_v25 = vadd.f32 %v1988_v29, %v1940_v23  ;;  %v1956_v44 = vpop.f32.mrf.mxu3 }
 0x2dc   : > { %v1957_v6 = vadd.f32 %v1956_v44, %v1908_v17 }
 0x2dd   : > { %v2038_v13 = vadd.f32 %v2037_v54, %v1989_v25 }
 0x2df   : > { %v2074_v35 = vmax.f32 %v2038_v13, 0.0 }
 0x2e1   : > { %v2248_v25 = vpop.f32.mrf.mxu2 }
 0x2e2   : > { %v1990_v40 = vpop.f32.mrf.mxu0 }
 0x2e3   : > { %v1991_v1 = vadd.f32 %v1990_v40, %v1942_v55  ;;  %v2039_v58 = vpop.f32.mrf.mxu1 }
 0x2e5   : > { %v2040_v19 = vadd.f32 %v2039_v58, %v1991_v1  ;;  %v2335_v1 = vlaneseq }
 0x2e7   : > { %v2076_v52 = vmax.f32 %v2040_v19, 0.0  ;;  %v4620_v10 = vand.u32 127, %v2335_v1  ;;  %v2247_v19 = vadd.f32 %v4618_v30, %v2246_v57 }
 0x2e9   : > { %v2098_v47 = vpack.c.bf16 %v2076_v52, %v2074_v35  ;;  %v2251_v13 = vpop.f32.mrf.mxu2  ;;  %vm2337_vm1 = vcmp.lt.s32.totalorder %v4620_v10, 6 }
 0x2ea   : > { %v1993_v5 = vpop.f32.mrf.mxu0 }
 0x2eb   : > { %v2042_v20 = vpop.f32.mrf.mxu1  ;;  %2314 = vmatmul.bf16.gmra.mxu3 %v2098_v47  ;;  %v1994_v62 = vadd.f32 %v1993_v5, %v1945_v61  ;;  %v2249_v5 = vadd.f32 %v4618_v30, %v2248_v25 }
 0x2ed   : > { %v2043_v22 = vadd.f32 %v2042_v20, %v1994_v62  ;;  %v2252_v62 = vadd.f32 %v4618_v30, %v2251_v13 }
 0x2ef   : > { %v2078_v63 = vmax.f32 %v2043_v22, 0.0 }
 0x2f1   : > { %v2253_v58 = vpop.f32.mrf.mxu2 }
 0x2f2   : > { %v1995_v59 = vpop.f32.mrf.mxu0 }
 0x2f3   : > { %v1996_v15 = vadd.f32 %v1995_v59, %v1947_v37  ;;  %v2044_v38 = vpop.f32.mrf.mxu1 }
 0x2f5   : > { %v2045_v32 = vadd.f32 %v2044_v38, %v1996_v15  ;;  %v2254_v38 = vadd.f32 %v4618_v30, %v2253_v58 }
 0x2f7   : > { %v2080_v51 = vmax.f32 %v2045_v32, 0.0 }
 0x2f9   : > { %v2100_v18 = vpack.c.bf16 %v2080_v51, %v2078_v63  ;;  %v2256_v47 = vpop.f32.mrf.mxu2 }
 0x2fa   : > { %v1998_v28 = vpop.f32.mrf.mxu0 }
 0x2fb   : > { %v2047_v21 = vpop.f32.mrf.mxu1  ;;  %2319 = vmatmul.bf16.gmra.mxu3 %v2100_v18  ;;  %v1999_v8 = vadd.f32 %v1998_v28, %v1950_v46  ;;  %v2257_v18 = vadd.f32 %v4618_v30, %v2256_v47 }
 0x2fd   : > { %v2048_v31 = vadd.f32 %v2047_v21, %v1999_v8 }
 0x2ff   : > { %v2082_v14 = vmax.f32 %v2048_v31, 0.0 }
 0x301   : > { %v2258_v37 = vpop.f32.mrf.mxu2 }
 0x302   : > { %v2000_v11 = vpop.f32.mrf.mxu0  ;;  %v2259_v8 = vadd.f32 %v4618_v30, %v2258_v37 }
 0x303   : > { %v2001_v60 = vadd.f32 %v2000_v11, %v1952_v48  ;;  %v2049_v41 = vpop.f32.mrf.mxu1 }
 0x305   : > { %v2050_v27 = vadd.f32 %v2049_v41, %v2001_v60 }
 0x307   : > { %v2084_v45 = vmax.f32 %v2050_v27, 0.0 }
 0x309   : > { %v2102_v12 = vpack.c.bf16 %v2084_v45, %v2082_v14  ;;  %v2261_v51 = vpop.f32.mrf.mxu2 }
 0x30a   : > { %v2003_v49 = vpop.f32.mrf.mxu0  ;;  %v2262_v41 = vadd.f32 %v4618_v30, %v2261_v51 }
 0x30b   : > { %v2052_v16 = vpop.f32.mrf.mxu1  ;;  %2324 = vmatmul.bf16.gmra.mxu3 %v2102_v12  ;;  %v2004_v3 = vadd.f32 %v2003_v49, %v1955_v4 }
 0x30d   : > { %v2053_v54 = vadd.f32 %v2052_v16, %v2004_v3 }
 0x30f   : > { %v2086_v55 = vmax.f32 %v2053_v54, 0.0 }
 0x311   : > { %v2263_v46 = vpop.f32.mrf.mxu2 }
 0x312   : > { %v2005_v29 = vpop.f32.mrf.mxu0  ;;  %v2264_v56 = vadd.f32 %v4618_v30, %v2263_v46 }
 0x313   : > { %v2006_v23 = vadd.f32 %v2005_v29, %v1957_v6  ;;  %v2054_v34 = vpop.f32.mrf.mxu1 }
 0x315   : > { %v2055_v7 = vadd.f32 %v2054_v34, %v2006_v23 }
 0x317   : > { %v2088_v39 = vmax.f32 %v2055_v7, 0.0 }
 0x319   : > { %v2104_v40 = vpack.c.bf16 %v2088_v39, %v2086_v55  ;;  %v2266_v60 = vpop.f32.mrf.mxu2 }
 0x31a   : > { %v2267_v17 = vadd.f32 %v4618_v30, %v2266_v60 }
 0x31b   : > { %2329 = vmatmul.bf16.gmra.mxu3 %v2104_v40 }
 0x321   : > { %v2268_v12 = vpop.f32.mrf.mxu2 }
 0x322   : > { %v2269_v23 = vadd.f32 %v4618_v30, %v2268_v12 }
 0x329   : > { %v2271_v6 = vpop.f32.mrf.mxu2 }
 0x32a   : > { %v2272_v40 = vadd.f32 %v4618_v30, %v2271_v6 }
 0x32e   : > { %v2295_v35 = vpop.f32.mrf.mxu3 }
 0x32f   : > { %v2296_v52 = vadd.f32 %v2295_v35, %v2247_v19 }
 0x331   : > { %v2338_v53 = vmax.f32 %v2296_v52, 0.0  ;;  %v2273_v55 = vpop.f32.mrf.mxu2 }
 0x333   : > { %v2354_v9 = vsel %vm2337_vm1, %v2338_v53, %v2296_v52  ;;  %v2274_v52 = vadd.f32 %v4618_v30, %v2273_v55 }
 0x334   : > { %2370 = vst [vmem:[%s4629_s20] sm:$0xff] %v2354_v9 }
 0x336   : > { %v2297_v20 = vpop.f32.mrf.mxu3 }
 0x337   : > { %v2298_v61 = vadd.f32 %v2297_v20, %v2249_v5 }
 0x339   : > { %v2339_v0 = vmax.f32 %v2298_v61, 0.0  ;;  %v2276_v35 = vpop.f32.mrf.mxu2 }
 0x33a   : > { %v2277_v20 = vadd.f32 %v4618_v30, %v2276_v35 }
 0x33b   : > { %v2355_v43 = vsel %vm2337_vm1, %v2339_v0, %v2298_v61 }
 0x33c   : > { %2371 = vst [vmem:[%s4629_s20 + $0x8] sm:$0xff] %v2355_v43 }
 0x33e   : > { %v2300_v36 = vpop.f32.mrf.mxu3 }
 0x33f   : > { %v2301_v59 = vadd.f32 %v2300_v36, %v2252_v62 }
 0x341   : > { %v2340_v22 = vmax.f32 %v2301_v59, 0.0  ;;  %v2278_v61 = vpop.f32.mrf.mxu2 }
 0x342   : > { %v2279_v36 = vadd.f32 %v4618_v30, %v2278_v61 }
 0x343   : > { %v2356_v15 = vsel %vm2337_vm1, %v2340_v22, %v2301_v59 }
 0x344   : > { %2372 = vst [vmem:[%s4629_s20 + $0x10] sm:$0xff] %v2356_v15 }
 0x346   : > { %v2302_v32 = vpop.f32.mrf.mxu3 }
 0x347   : > { %v2303_v63 = vadd.f32 %v2302_v32, %v2254_v38 }
 0x349   : > { %v2341_v50 = vmax.f32 %v2303_v63, 0.0  ;;  %v2281_v15 = vpop.f32.mrf.mxu2 }
 0x34b   : > { %v2357_v26 = vsel %vm2337_vm1, %v2341_v50, %v2303_v63  ;;  %v2282_v63 = vadd.f32 %v4618_v30, %v2281_v15 }
 0x34c   : > { %2373 = vst [vmem:[%s4629_s20 + $0x18] sm:$0xff] %v2357_v26 }
 0x34e   : > { %v2305_v28 = vpop.f32.mrf.mxu3 }
 0x34f   : > { %v2306_v21 = vadd.f32 %v2305_v28, %v2257_v18 }
 0x351   : > { %v2342_v24 = vmax.f32 %v2306_v21, 0.0  ;;  %v2283_v18 = vpop.f32.mrf.mxu2 }
 0x353   : > { %v2358_v42 = vsel %vm2337_vm1, %v2342_v24, %v2306_v21  ;;  %v2284_v21 = vadd.f32 %v4618_v30, %v2283_v18 }
 0x354   : > { %2374 = vst [vmem:[%s4629_s20 + $0x20] sm:$0xff] %v2358_v42 }
 0x356   : > { %v2307_v48 = vpop.f32.mrf.mxu3 }
 0x357   : > { %v2308_v2 = vadd.f32 %v2307_v48, %v2259_v8 }
 0x359   : > { %v2343_v11 = vmax.f32 %v2308_v2, 0.0 }
 0x35b   : > { %v2359_v31 = vsel %vm2337_vm1, %v2343_v11, %v2308_v2 }
 0x35c   : > { %2375 = vst [vmem:[%s4629_s20 + $0x28] sm:$0xff] %v2359_v31 }
 0x35e   : > { %v2310_v27 = vpop.f32.mrf.mxu3 }
 0x35f   : > { %v2311_v33 = vadd.f32 %v2310_v27, %v2262_v41 }
 0x361   : > { %v2344_v14 = vmax.f32 %v2311_v33, 0.0 }
 0x363   : > { %v2360_v45 = vsel %vm2337_vm1, %v2344_v14, %v2311_v33 }
 0x364   : > { %2376 = vst [vmem:[%s4629_s20 + $0x30] sm:$0xff] %v2360_v45 }
 0x366   : > { %v2312_v49 = vpop.f32.mrf.mxu3 }
 0x367   : > { %v2313_v16 = vadd.f32 %v2312_v49, %v2264_v56 }
 0x369   : > { %v2345_v57 = vmax.f32 %v2313_v16, 0.0 }
 0x36b   : > { %v2361_v4 = vsel %vm2337_vm1, %v2345_v57, %v2313_v16 }
 0x36c   : > { %2377 = vst [vmem:[%s4629_s20 + $0x38] sm:$0xff] %v2361_v4 }
 0x36e   : > { %v2315_v3 = vpop.f32.mrf.mxu3 }
 0x36f   : > { %v2316_v44 = vadd.f32 %v2315_v3, %v2267_v17 }
 0x371   : > { %v2346_v29 = vmax.f32 %v2316_v44, 0.0 }
 0x373   : > { %v2362_v54 = vsel %vm2337_vm1, %v2346_v29, %v2316_v44 }
 0x374   : > { %2378 = vst [vmem:[%s4629_s20 + $0x40] sm:$0xff] %v2362_v54 }
 0x376   : > { %v2317_v34 = vpop.f32.mrf.mxu3 }
 0x377   : > { %v2318_v7 = vadd.f32 %v2317_v34, %v2269_v23 }
 0x379   : > { %v2347_v25 = vmax.f32 %v2318_v7, 0.0 }
 0x37b   : > { %v2363_v39 = vsel %vm2337_vm1, %v2347_v25, %v2318_v7 }
 0x37c   : > { %2379 = vst [vmem:[%s4629_s20 + $0x48] sm:$0xff] %v2363_v39 }
 0x37e   : > { %v2320_v13 = vpop.f32.mrf.mxu3 }
 0x37f   : > { %v2321_v1 = vadd.f32 %v2320_v13, %v2272_v40 }
 0x381   : > { %v2348_v58 = vmax.f32 %v2321_v1, 0.0 }
 0x383   : > { %v2364_v19 = vsel %vm2337_vm1, %v2348_v58, %v2321_v1 }
 0x384   : > { %2380 = vst [vmem:[%s4629_s20 + $0x50] sm:$0xff] %v2364_v19 }
 0x386   : > { %v2322_v53 = vpop.f32.mrf.mxu3 }
 0x387   : > { %v2323_v9 = vadd.f32 %v2322_v53, %v2274_v52 }
 0x389   : > { %v2349_v47 = vmax.f32 %v2323_v9, 0.0 }
 0x38b   : > { %v2365_v5 = vsel %vm2337_vm1, %v2349_v47, %v2323_v9 }
 0x38c   : > { %2381 = vst [vmem:[%s4629_s20 + $0x58] sm:$0xff] %v2365_v5 }
 0x38e   : > { %v2325_v0 = vpop.f32.mrf.mxu3 }
 0x38f   : > { %v2326_v43 = vadd.f32 %v2325_v0, %v2277_v20 }
 0x391   : > { %v2350_v62 = vmax.f32 %v2326_v43, 0.0 }
 0x393   : > { %v2366_v37 = vsel %vm2337_vm1, %v2350_v62, %v2326_v43 }
 0x394   : > { %2382 = vst [vmem:[%s4629_s20 + $0x60] sm:$0xff] %v2366_v37 }
 0x396   : > { %v2327_v59 = vpop.f32.mrf.mxu3 }
 0x397   : > { %v2328_v22 = vadd.f32 %v2327_v59, %v2279_v36 }
 0x399   : > { %v2351_v38 = vmax.f32 %v2328_v22, 0.0 }
 0x39b   : > { %v2367_v32 = vsel %vm2337_vm1, %v2351_v38, %v2328_v22 }
 0x39c   : > { %2383 = vst [vmem:[%s4629_s20 + $0x68] sm:$0xff] %v2367_v32 }
 0x39e   : > { %v2330_v51 = vpop.f32.mrf.mxu3 }
 0x39f   : > { %v2331_v50 = vadd.f32 %v2330_v51, %v2282_v63 }
 0x3a1   : > { %v2352_v26 = vmax.f32 %v2331_v50, 0.0 }
 0x3a3   : > { %v2368_v28 = vsel %vm2337_vm1, %v2352_v26, %v2331_v50 }
 0x3a4   : > { %2384 = vst [vmem:[%s4629_s20 + $0x70] sm:$0xff] %v2368_v28 }
 0x3a6   : > { %v2332_v24 = vpop.f32.mrf.mxu3 }
 0x3a7   : > { %v2333_v46 = vadd.f32 %v2332_v24, %v2284_v21 }
 0x3a9   : > { %v2353_v42 = vmax.f32 %v2333_v46, 0.0 }
 0x3ab   : > { %v2369_v8 = vsel %vm2337_vm1, %v2353_v42, %v2333_v46 }
 0x3ac   : > { %2385 = vst [vmem:[%s4629_s20 + $0x78] sm:$0xff] %v2369_v8 }
 0x3ad PF: > { %s16_s21 = sadd.s32 1, %s3197_s21  }
 0x3ae   : > { %p13_p4 = scmp.ge.s32.totalorder %s16_s21, 4  }
 0x3b0   :  { %15 = sbr.rel (!%p13_p4) target bundleno = 1 (0x1), region = 74 }

</bundles_post_ra>
